<compile_context>
chip_gen: v6e
topology: v6e:2x2x1
jax: 0.10.0
libtpu: 0.0.40
codegen_flags: <defaults>
</compile_context>

<pallas_src>
import functools
import math

import jax
import jax.numpy as jnp
from jax.experimental import pallas as pl
from jax.experimental.pallas import tpu as pltpu

# ----------------------- tiny synthetic BERT config -----------------------
VOCAB = 100
HIDDEN = 32
NHEAD = 4
DHEAD = HIDDEN // NHEAD
NLAYER = 2
INTERMEDIATE = 64
MAXPOS = 16
EPS = 1e-12  # HF BERT layer-norm eps


# ------------------------------ kernel helpers ------------------------------
def _layer_norm(x, g, b):
    mu = jnp.mean(x, axis=-1, keepdims=True)
    var = jnp.mean((x - mu) ** 2, axis=-1, keepdims=True)
    return (x - mu) * jax.lax.rsqrt(var + EPS) * g + b


def _gelu(x):
    # TODO(synk): HF BERT uses exact erf-based GELU; tanh approximation used here
    # (erf has no guaranteed Mosaic lowering).
    return 0.5 * x * (1.0 + jnp.tanh(0.7978845608028654 * (x + 0.044715 * x * x * x)))


# --------------------------- fused forward kernel ---------------------------
def _fused_bert_kernel(
    emb_ref, mask_ref, emb_g_ref, emb_b_ref,
    wqkv_ref, bqkv_ref, wo_ref, bo_ref, ln1g_ref, ln1b_ref,
    w1_ref, b1_ref, w2_ref, b2_ref, ln2g_ref, ln2b_ref,
    pool_w_ref, pool_b_ref, cls_w_ref, cls_b_ref,
    out_ref, *, B, S,
):
    f32 = jnp.float32
    scale = 1.0 / math.sqrt(DHEAD)

    # Embedding layer-norm (no zero-residual add).
    h = _layer_norm(emb_ref[...], emb_g_ref[...], emb_b_ref[...])        # (B*S, H)
    mask = mask_ref[...]                                                 # (B, 1, S) additive

    for l in range(NLAYER):                 # static unroll; weights stay VMEM-resident
        # ---- fused Q/K/V projection: one MXU push with N = 3H ----
        qkv = jnp.dot(h, wqkv_ref[l], preferred_element_type=f32) + bqkv_ref[l]   # (B*S, 3H)
        wo_l = wo_ref[l]                                                          # (H, H)

        attn = jnp.zeros((B * S, HIDDEN), f32)
        for hd in range(NHEAD):             # static unroll, all inside one launch
            c = hd * DHEAD
            q = qkv[:, c:c + DHEAD].reshape(B, S, DHEAD)
            k = qkv[:, HIDDEN + c:HIDDEN + c + DHEAD].reshape(B, S, DHEAD)
            v = qkv[:, 2 * HIDDEN + c:2 * HIDDEN + c + DHEAD].reshape(B, S, DHEAD)

            # batched q @ k^T without materializing a transpose of k
            s = jax.lax.dot_general(
                q, k, (((2,), (2,)), ((0,), (0,))),
                preferred_element_type=f32) * scale + mask               # (B, S, S)
            s = s - jnp.max(s, axis=-1, keepdims=True)
            p = jnp.exp(s)
            p = p * pl.reciprocal(jnp.sum(p, axis=-1, keepdims=True), approx=True)
            ctx = jax.lax.dot_general(
                p, v, (((2,), (1,)), ((0,), (0,))),
                preferred_element_type=f32)                              # (B, S, Dh)

            # merge heads directly through the per-head row-slice of Wo
            attn = attn + jnp.dot(ctx.reshape(B * S, DHEAD),
                                  wo_l[c:c + DHEAD, :],
                                  preferred_element_type=f32)            # (B*S, H)
        attn = attn + bo_ref[l]

        h = _layer_norm(attn + h, ln1g_ref[l], ln1b_ref[l])
        ffn = _gelu(jnp.dot(h, w1_ref[l], preferred_element_type=f32) + b1_ref[l])
        ffn = jnp.dot(ffn, w2_ref[l], preferred_element_type=f32) + b2_ref[l]
        h = _layer_norm(ffn + h, ln2g_ref[l], ln2b_ref[l])

    # ---- pooler (tanh on CLS token) + IR classification + sigmoid, fused ----
    cls = h.reshape(B, S, HIDDEN)[:, 0, :]                               # (B, H)
    pooled = jnp.tanh(
        jnp.dot(cls, pool_w_ref[...], preferred_element_type=f32) + pool_b_ref[...])
    logits = jnp.dot(pooled, cls_w_ref[...], preferred_element_type=f32) + cls_b_ref[...]
    out_ref[...] = pl.reciprocal(1.0 + jnp.exp(-logits), approx=True)    # sigmoid, (B, 1)


# --------------------------- parameter packing ------------------------------
def _pack_layer_params(layers):
    stk = lambda name: jnp.stack([l[name] for l in layers])
    row = lambda name: stk(name)[:, None, :]
    # fuse Q/K/V weights to a single (H, 3H) matmul per layer
    wqkv = jnp.stack(
        [jnp.concatenate([l["wq"], l["wk"], l["wv"]], axis=1) for l in layers])
    bqkv = jnp.stack(
        [jnp.concatenate([l["bq"], l["bk"], l["bv"]], axis=0) for l in layers])[:, None, :]
    return (wqkv, bqkv, stk("wo"), row("bo"), row("ln1_g"), row("ln1_b"),
            stk("w1"), row("b1"), stk("w2"), row("b2"), row("ln2_g"), row("ln2_b"))


# ------------------------------ model forward ------------------------------
@jax.jit
def bert_ir_forward(params, input_ids, attention_mask, token_type_ids=None):
    B, S = input_ids.shape
    if token_type_ids is None:
        token_type_ids = jnp.zeros_like(input_ids)

    # Embedding table gathers are glue (plain JAX); everything else is one fused kernel.
    emb = (params["word_emb"][input_ids]
           + params["pos_emb"][jnp.arange(S)][None, :, :]
           + params["type_emb"][token_type_ids]).astype(jnp.float32).reshape(B * S, HIDDEN)
    add_mask = ((1.0 - attention_mask.astype(jnp.float32)) * -1e9).reshape(B, 1, S)

    packed = _pack_layer_params(params["layers"])

    prob = pl.pallas_call(
        functools.partial(_fused_bert_kernel, B=B, S=S),
        out_shape=jax.ShapeDtypeStruct((B, 1), jnp.float32),
        compiler_params=pltpu.CompilerParams(vmem_limit_bytes=32 * 1024 * 1024),
    )(emb, add_mask,
      params["emb_ln_g"].reshape(1, HIDDEN), params["emb_ln_b"].reshape(1, HIDDEN),
      *packed,
      params["pool_w"], params["pool_b"].reshape(1, HIDDEN),
      params["cls_w"], params["cls_b"].reshape(1, 1))
    return prob[:, 0]  # (B,) probabilities


# ------------------------------ parameter init ------------------------------
def init_params(key):
    keys = iter(jax.random.split(key, 64))

    def nrm(shape):
        return jax.random.normal(next(keys), shape, jnp.float32) * 0.02

    params = {
        "word_emb": nrm((VOCAB, HIDDEN)),
        "pos_emb": nrm((MAXPOS, HIDDEN)),
        "type_emb": nrm((2, HIDDEN)),
        "emb_ln_g": jnp.ones((HIDDEN,), jnp.float32),
        "emb_ln_b": jnp.zeros((HIDDEN,), jnp.float32),
        "pool_w": nrm((HIDDEN, HIDDEN)),
        "pool_b": jnp.zeros((HIDDEN,), jnp.float32),
        "cls_w": nrm((HIDDEN, 1)),
        "cls_b": jnp.zeros((1,), jnp.float32),
        "layers": [],
    }
    for _ in range(NLAYER):
        params["layers"].append({
            "wq": nrm((HIDDEN, HIDDEN)), "bq": jnp.zeros((HIDDEN,), jnp.float32),
            "wk": nrm((HIDDEN, HIDDEN)), "bk": jnp.zeros((HIDDEN,), jnp.float32),
            "wv": nrm((HIDDEN, HIDDEN)), "bv": jnp.zeros((HIDDEN,), jnp.float32),
            "wo": nrm((HIDDEN, HIDDEN)), "bo": jnp.zeros((HIDDEN,), jnp.float32),
            "ln1_g": jnp.ones((HIDDEN,), jnp.float32),
            "ln1_b": jnp.zeros((HIDDEN,), jnp.float32),
            "w1": nrm((HIDDEN, INTERMEDIATE)), "b1": jnp.zeros((INTERMEDIATE,), jnp.float32),
            "w2": nrm((INTERMEDIATE, HIDDEN)), "b2": jnp.zeros((HIDDEN,), jnp.float32),
            "ln2_g": jnp.ones((HIDDEN,), jnp.float32),
            "ln2_b": jnp.zeros((HIDDEN,), jnp.float32),
        })
    return params


if __name__ == "__main__":
    key = jax.random.PRNGKey(0)
    pkey, ikey = jax.random.split(key)
    params = init_params(pkey)

    B, S = 2, 8
    input_ids = jax.random.randint(ikey, (B, S), 0, VOCAB, dtype=jnp.int32)
    attention_mask = jnp.array([[1, 1, 1, 1, 1, 1, 1, 1],
                                [1, 1, 1, 1, 1, 1, 0, 0]], dtype=jnp.int32)
    token_type_ids = jnp.zeros((B, S), dtype=jnp.int32)

    probs = bert_ir_forward(params, input_ids, attention_mask, token_type_ids)
    jax.block_until_ready(probs)
    assert probs.shape == (B,)
    assert bool(jnp.all((probs >= 0.0) & (probs <= 1.0)))
    print("KERNEL_OK")
</pallas_src>

<mosaic_0001>
module attributes {stable_mosaic.version = 11 : i64} {
  func.func @_fused_bert_kernel(%arg0: memref<16x32xf32, #tpu.memory_space<vmem>>, %arg1: memref<2x1x8xf32, #tpu.memory_space<vmem>>, %arg2: memref<1x32xf32, #tpu.memory_space<vmem>>, %arg3: memref<1x32xf32, #tpu.memory_space<vmem>>, %arg4: memref<2x32x96xf32, #tpu.memory_space<vmem>>, %arg5: memref<2x1x96xf32, #tpu.memory_space<vmem>>, %arg6: memref<2x32x32xf32, #tpu.memory_space<vmem>>, %arg7: memref<2x1x32xf32, #tpu.memory_space<vmem>>, %arg8: memref<2x1x32xf32, #tpu.memory_space<vmem>>, %arg9: memref<2x1x32xf32, #tpu.memory_space<vmem>>, %arg10: memref<2x32x64xf32, #tpu.memory_space<vmem>>, %arg11: memref<2x1x64xf32, #tpu.memory_space<vmem>>, %arg12: memref<2x64x32xf32, #tpu.memory_space<vmem>>, %arg13: memref<2x1x32xf32, #tpu.memory_space<vmem>>, %arg14: memref<2x1x32xf32, #tpu.memory_space<vmem>>, %arg15: memref<2x1x32xf32, #tpu.memory_space<vmem>>, %arg16: memref<32x32xf32, #tpu.memory_space<vmem>>, %arg17: memref<1x32xf32, #tpu.memory_space<vmem>>, %arg18: memref<32x1xf32, #tpu.memory_space<vmem>>, %arg19: memref<1x1xf32, #tpu.memory_space<vmem>>, %arg20: memref<2x1xf32, #tpu.memory_space<vmem>>) attributes {dimension_semantics = [], scalar_prefetch = 0 : i64, scratch_operands = 0 : i64, tpu.core_type = #tpu.core_type<tc>} {
    %c0 = arith.constant 0 : index
    %c0_0 = arith.constant 0 : index
    %0 = vector.load %arg0[%c0, %c0_0] : memref<16x32xf32, #tpu.memory_space<vmem>>, vector<16x32xf32>
    %c0_1 = arith.constant 0 : index
    %c0_2 = arith.constant 0 : index
    %1 = vector.load %arg2[%c0_1, %c0_2] : memref<1x32xf32, #tpu.memory_space<vmem>>, vector<1x32xf32>
    %c0_3 = arith.constant 0 : index
    %c0_4 = arith.constant 0 : index
    %2 = vector.load %arg3[%c0_3, %c0_4] : memref<1x32xf32, #tpu.memory_space<vmem>>, vector<1x32xf32>
    %cst = arith.constant dense<0.000000e+00> : vector<16xf32>
    %3 = vector.multi_reduction <add>, %0, %cst [1] : vector<16x32xf32> to vector<16xf32>
    %4 = vector.shape_cast %3 : vector<16xf32> to vector<16x1xf32>
    %cst_5 = arith.constant 3.200000e+01 : f32
    %5 = vector.broadcast %cst_5 : f32 to vector<16x1xf32>
    %6 = arith.divf %4, %5 : vector<16x1xf32>
    %7 = vector.broadcast %6 : vector<16x1xf32> to vector<16x32xf32>
    %8 = arith.subf %0, %7 : vector<16x32xf32>
    %9 = arith.mulf %8, %8 : vector<16x32xf32>
    %cst_6 = arith.constant dense<0.000000e+00> : vector<16xf32>
    %10 = vector.multi_reduction <add>, %9, %cst_6 [1] : vector<16x32xf32> to vector<16xf32>
    %11 = vector.shape_cast %10 : vector<16xf32> to vector<16x1xf32>
    %cst_7 = arith.constant 3.200000e+01 : f32
    %12 = vector.broadcast %cst_7 : f32 to vector<16x1xf32>
    %13 = arith.divf %11, %12 : vector<16x1xf32>
    %14 = vector.broadcast %6 : vector<16x1xf32> to vector<16x32xf32>
    %15 = arith.subf %0, %14 : vector<16x32xf32>
    %cst_8 = arith.constant 9.99999996E-13 : f32
    %16 = vector.broadcast %cst_8 : f32 to vector<16x1xf32>
    %17 = arith.addf %13, %16 : vector<16x1xf32>
    %18 = math.rsqrt %17 : vector<16x1xf32>
    %19 = vector.broadcast %18 : vector<16x1xf32> to vector<16x32xf32>
    %20 = arith.mulf %15, %19 : vector<16x32xf32>
    %21 = vector.broadcast %1 : vector<1x32xf32> to vector<16x32xf32>
    %22 = arith.mulf %20, %21 : vector<16x32xf32>
    %23 = vector.broadcast %2 : vector<1x32xf32> to vector<16x32xf32>
    %24 = arith.addf %22, %23 : vector<16x32xf32>
    %c0_9 = arith.constant 0 : index
    %c0_10 = arith.constant 0 : index
    %c0_11 = arith.constant 0 : index
    %25 = vector.load %arg1[%c0_9, %c0_10, %c0_11] : memref<2x1x8xf32, #tpu.memory_space<vmem>>, vector<2x1x8xf32>
    %c0_12 = arith.constant 0 : index
    %c0_13 = arith.constant 0 : index
    %c0_14 = arith.constant 0 : index
    %26 = vector.load %arg4[%c0_12, %c0_13, %c0_14] : memref<2x32x96xf32, #tpu.memory_space<vmem>>, vector<1x32x96xf32>
    %27 = vector.shape_cast %26 : vector<1x32x96xf32> to vector<32x96xf32>
    %cst_15 = arith.constant dense<0.000000e+00> : vector<16x96xf32>
    %28 = tpu.matmul %24, %27, %cst_15 {dimension_numbers = #tpu.dot_dimension_numbers<[1], [0], [0], [1], [0, 0, 1, 1], [], []>} : vector<16x32xf32>, vector<32x96xf32>, vector<16x96xf32> -> vector<16x96xf32>
    %c0_16 = arith.constant 0 : index
    %c0_17 = arith.constant 0 : index
    %c0_18 = arith.constant 0 : index
    %29 = vector.load %arg5[%c0_16, %c0_17, %c0_18] : memref<2x1x96xf32, #tpu.memory_space<vmem>>, vector<1x1x96xf32>
    %30 = vector.shape_cast %29 : vector<1x1x96xf32> to vector<1x96xf32>
    %31 = vector.broadcast %30 : vector<1x96xf32> to vector<16x96xf32>
    %32 = arith.addf %28, %31 : vector<16x96xf32>
    %c0_19 = arith.constant 0 : index
    %c0_20 = arith.constant 0 : index
    %c0_21 = arith.constant 0 : index
    %33 = vector.load %arg6[%c0_19, %c0_20, %c0_21] : memref<2x32x32xf32, #tpu.memory_space<vmem>>, vector<1x32x32xf32>
    %34 = vector.shape_cast %33 : vector<1x32x32xf32> to vector<32x32xf32>
    %cst_22 = arith.constant 0.000000e+00 : f32
    %35 = vector.broadcast %cst_22 : f32 to vector<16x32xf32>
    %36 = vector.extract_strided_slice %32 {offsets = [0, 0], sizes = [16, 8], strides = [1, 1]} : vector<16x96xf32> to vector<16x8xf32>
    %37 = vector.shape_cast %36 : vector<16x8xf32> to vector<2x8x8xf32>
    %38 = vector.extract_strided_slice %32 {offsets = [0, 32], sizes = [16, 8], strides = [1, 1]} : vector<16x96xf32> to vector<16x8xf32>
    %39 = vector.shape_cast %38 : vector<16x8xf32> to vector<2x8x8xf32>
    %40 = vector.extract_strided_slice %32 {offsets = [0, 64], sizes = [16, 8], strides = [1, 1]} : vector<16x96xf32> to vector<16x8xf32>
    %41 = vector.shape_cast %40 : vector<16x8xf32> to vector<2x8x8xf32>
    %cst_23 = arith.constant dense<0.000000e+00> : vector<2x8x8xf32>
    %42 = tpu.matmul %37, %39, %cst_23 {dimension_numbers = #tpu.dot_dimension_numbers<[2], [2], [1], [1], [0, 0, 0, 1, 1, 1], [0], [0]>} : vector<2x8x8xf32>, vector<2x8x8xf32>, vector<2x8x8xf32> -> vector<2x8x8xf32>
    %cst_24 = arith.constant 0.353553385 : f32
    %43 = vector.broadcast %cst_24 : f32 to vector<2x8x8xf32>
    %44 = arith.mulf %42, %43 : vector<2x8x8xf32>
    %45 = vector.broadcast %25 : vector<2x1x8xf32> to vector<2x8x8xf32>
    %46 = arith.addf %44, %45 : vector<2x8x8xf32>
    %cst_25 = arith.constant dense<0xFF800000> : vector<2x8xf32>
    %47 = vector.multi_reduction <maximumf>, %46, %cst_25 [2] : vector<2x8x8xf32> to vector<2x8xf32>
    %48 = vector.shape_cast %47 : vector<2x8xf32> to vector<2x8x1xf32>
    %49 = vector.broadcast %48 : vector<2x8x1xf32> to vector<2x8x8xf32>
    %50 = arith.subf %46, %49 : vector<2x8x8xf32>
    %51 = math.exp %50 : vector<2x8x8xf32>
    %cst_26 = arith.constant dense<0.000000e+00> : vector<2x8xf32>
    %52 = vector.multi_reduction <add>, %51, %cst_26 [2] : vector<2x8x8xf32> to vector<2x8xf32>
    %53 = vector.shape_cast %52 : vector<2x8xf32> to vector<2x8x1xf32>
    %54 = tpu.reciprocal %53 {approx = true} : vector<2x8x1xf32> -> vector<2x8x1xf32>
    %55 = vector.broadcast %54 : vector<2x8x1xf32> to vector<2x8x8xf32>
    %56 = arith.mulf %51, %55 : vector<2x8x8xf32>
    %cst_27 = arith.constant dense<0.000000e+00> : vector<2x8x8xf32>
    %57 = tpu.matmul %56, %41, %cst_27 {dimension_numbers = #tpu.dot_dimension_numbers<[2], [1], [1], [2], [0, 0, 0, 1, 1, 2], [0], [0]>} : vector<2x8x8xf32>, vector<2x8x8xf32>, vector<2x8x8xf32> -> vector<2x8x8xf32>
    %58 = vector.shape_cast %57 : vector<2x8x8xf32> to vector<16x8xf32>
    %59 = vector.extract_strided_slice %34 {offsets = [0, 0], sizes = [8, 32], strides = [1, 1]} : vector<32x32xf32> to vector<8x32xf32>
    %cst_28 = arith.constant dense<0.000000e+00> : vector<16x32xf32>
    %60 = tpu.matmul %58, %59, %cst_28 {dimension_numbers = #tpu.dot_dimension_numbers<[1], [0], [0], [1], [0, 0, 1, 1], [], []>} : vector<16x8xf32>, vector<8x32xf32>, vector<16x32xf32> -> vector<16x32xf32>
    %61 = arith.addf %35, %60 : vector<16x32xf32>
    %62 = vector.extract_strided_slice %32 {offsets = [0, 8], sizes = [16, 8], strides = [1, 1]} : vector<16x96xf32> to vector<16x8xf32>
    %63 = vector.shape_cast %62 : vector<16x8xf32> to vector<2x8x8xf32>
    %64 = vector.extract_strided_slice %32 {offsets = [0, 40], sizes = [16, 8], strides = [1, 1]} : vector<16x96xf32> to vector<16x8xf32>
    %65 = vector.shape_cast %64 : vector<16x8xf32> to vector<2x8x8xf32>
    %66 = vector.extract_strided_slice %32 {offsets = [0, 72], sizes = [16, 8], strides = [1, 1]} : vector<16x96xf32> to vector<16x8xf32>
    %67 = vector.shape_cast %66 : vector<16x8xf32> to vector<2x8x8xf32>
    %cst_29 = arith.constant dense<0.000000e+00> : vector<2x8x8xf32>
    %68 = tpu.matmul %63, %65, %cst_29 {dimension_numbers = #tpu.dot_dimension_numbers<[2], [2], [1], [1], [0, 0, 0, 1, 1, 1], [0], [0]>} : vector<2x8x8xf32>, vector<2x8x8xf32>, vector<2x8x8xf32> -> vector<2x8x8xf32>
    %cst_30 = arith.constant 0.353553385 : f32
    %69 = vector.broadcast %cst_30 : f32 to vector<2x8x8xf32>
    %70 = arith.mulf %68, %69 : vector<2x8x8xf32>
    %71 = vector.broadcast %25 : vector<2x1x8xf32> to vector<2x8x8xf32>
    %72 = arith.addf %70, %71 : vector<2x8x8xf32>
    %cst_31 = arith.constant dense<0xFF800000> : vector<2x8xf32>
    %73 = vector.multi_reduction <maximumf>, %72, %cst_31 [2] : vector<2x8x8xf32> to vector<2x8xf32>
    %74 = vector.shape_cast %73 : vector<2x8xf32> to vector<2x8x1xf32>
    %75 = vector.broadcast %74 : vector<2x8x1xf32> to vector<2x8x8xf32>
    %76 = arith.subf %72, %75 : vector<2x8x8xf32>
    %77 = math.exp %76 : vector<2x8x8xf32>
    %cst_32 = arith.constant dense<0.000000e+00> : vector<2x8xf32>
    %78 = vector.multi_reduction <add>, %77, %cst_32 [2] : vector<2x8x8xf32> to vector<2x8xf32>
    %79 = vector.shape_cast %78 : vector<2x8xf32> to vector<2x8x1xf32>
    %80 = tpu.reciprocal %79 {approx = true} : vector<2x8x1xf32> -> vector<2x8x1xf32>
    %81 = vector.broadcast %80 : vector<2x8x1xf32> to vector<2x8x8xf32>
    %82 = arith.mulf %77, %81 : vector<2x8x8xf32>
    %cst_33 = arith.constant dense<0.000000e+00> : vector<2x8x8xf32>
    %83 = tpu.matmul %82, %67, %cst_33 {dimension_numbers = #tpu.dot_dimension_numbers<[2], [1], [1], [2], [0, 0, 0, 1, 1, 2], [0], [0]>} : vector<2x8x8xf32>, vector<2x8x8xf32>, vector<2x8x8xf32> -> vector<2x8x8xf32>
    %84 = vector.shape_cast %83 : vector<2x8x8xf32> to vector<16x8xf32>
    %85 = vector.extract_strided_slice %34 {offsets = [8, 0], sizes = [8, 32], strides = [1, 1]} : vector<32x32xf32> to vector<8x32xf32>
    %cst_34 = arith.constant dense<0.000000e+00> : vector<16x32xf32>
    %86 = tpu.matmul %84, %85, %cst_34 {dimension_numbers = #tpu.dot_dimension_numbers<[1], [0], [0], [1], [0, 0, 1, 1], [], []>} : vector<16x8xf32>, vector<8x32xf32>, vector<16x32xf32> -> vector<16x32xf32>
    %87 = arith.addf %61, %86 : vector<16x32xf32>
    %88 = vector.extract_strided_slice %32 {offsets = [0, 16], sizes = [16, 8], strides = [1, 1]} : vector<16x96xf32> to vector<16x8xf32>
    %89 = vector.shape_cast %88 : vector<16x8xf32> to vector<2x8x8xf32>
    %90 = vector.extract_strided_slice %32 {offsets = [0, 48], sizes = [16, 8], strides = [1, 1]} : vector<16x96xf32> to vector<16x8xf32>
    %91 = vector.shape_cast %90 : vector<16x8xf32> to vector<2x8x8xf32>
    %92 = vector.extract_strided_slice %32 {offsets = [0, 80], sizes = [16, 8], strides = [1, 1]} : vector<16x96xf32> to vector<16x8xf32>
    %93 = vector.shape_cast %92 : vector<16x8xf32> to vector<2x8x8xf32>
    %cst_35 = arith.constant dense<0.000000e+00> : vector<2x8x8xf32>
    %94 = tpu.matmul %89, %91, %cst_35 {dimension_numbers = #tpu.dot_dimension_numbers<[2], [2], [1], [1], [0, 0, 0, 1, 1, 1], [0], [0]>} : vector<2x8x8xf32>, vector<2x8x8xf32>, vector<2x8x8xf32> -> vector<2x8x8xf32>
    %cst_36 = arith.constant 0.353553385 : f32
    %95 = vector.broadcast %cst_36 : f32 to vector<2x8x8xf32>
    %96 = arith.mulf %94, %95 : vector<2x8x8xf32>
    %97 = vector.broadcast %25 : vector<2x1x8xf32> to vector<2x8x8xf32>
    %98 = arith.addf %96, %97 : vector<2x8x8xf32>
    %cst_37 = arith.constant dense<0xFF800000> : vector<2x8xf32>
    %99 = vector.multi_reduction <maximumf>, %98, %cst_37 [2] : vector<2x8x8xf32> to vector<2x8xf32>
    %100 = vector.shape_cast %99 : vector<2x8xf32> to vector<2x8x1xf32>
    %101 = vector.broadcast %100 : vector<2x8x1xf32> to vector<2x8x8xf32>
    %102 = arith.subf %98, %101 : vector<2x8x8xf32>
    %103 = math.exp %102 : vector<2x8x8xf32>
    %cst_38 = arith.constant dense<0.000000e+00> : vector<2x8xf32>
    %104 = vector.multi_reduction <add>, %103, %cst_38 [2] : vector<2x8x8xf32> to vector<2x8xf32>
    %105 = vector.shape_cast %104 : vector<2x8xf32> to vector<2x8x1xf32>
    %106 = tpu.reciprocal %105 {approx = true} : vector<2x8x1xf32> -> vector<2x8x1xf32>
    %107 = vector.broadcast %106 : vector<2x8x1xf32> to vector<2x8x8xf32>
    %108 = arith.mulf %103, %107 : vector<2x8x8xf32>
    %cst_39 = arith.constant dense<0.000000e+00> : vector<2x8x8xf32>
    %109 = tpu.matmul %108, %93, %cst_39 {dimension_numbers = #tpu.dot_dimension_numbers<[2], [1], [1], [2], [0, 0, 0, 1, 1, 2], [0], [0]>} : vector<2x8x8xf32>, vector<2x8x8xf32>, vector<2x8x8xf32> -> vector<2x8x8xf32>
    %110 = vector.shape_cast %109 : vector<2x8x8xf32> to vector<16x8xf32>
    %111 = vector.extract_strided_slice %34 {offsets = [16, 0], sizes = [8, 32], strides = [1, 1]} : vector<32x32xf32> to vector<8x32xf32>
    %cst_40 = arith.constant dense<0.000000e+00> : vector<16x32xf32>
    %112 = tpu.matmul %110, %111, %cst_40 {dimension_numbers = #tpu.dot_dimension_numbers<[1], [0], [0], [1], [0, 0, 1, 1], [], []>} : vector<16x8xf32>, vector<8x32xf32>, vector<16x32xf32> -> vector<16x32xf32>
    %113 = arith.addf %87, %112 : vector<16x32xf32>
    %114 = vector.extract_strided_slice %32 {offsets = [0, 24], sizes = [16, 8], strides = [1, 1]} : vector<16x96xf32> to vector<16x8xf32>
    %115 = vector.shape_cast %114 : vector<16x8xf32> to vector<2x8x8xf32>
    %116 = vector.extract_strided_slice %32 {offsets = [0, 56], sizes = [16, 8], strides = [1, 1]} : vector<16x96xf32> to vector<16x8xf32>
    %117 = vector.shape_cast %116 : vector<16x8xf32> to vector<2x8x8xf32>
    %118 = vector.extract_strided_slice %32 {offsets = [0, 88], sizes = [16, 8], strides = [1, 1]} : vector<16x96xf32> to vector<16x8xf32>
    %119 = vector.shape_cast %118 : vector<16x8xf32> to vector<2x8x8xf32>
    %cst_41 = arith.constant dense<0.000000e+00> : vector<2x8x8xf32>
    %120 = tpu.matmul %115, %117, %cst_41 {dimension_numbers = #tpu.dot_dimension_numbers<[2], [2], [1], [1], [0, 0, 0, 1, 1, 1], [0], [0]>} : vector<2x8x8xf32>, vector<2x8x8xf32>, vector<2x8x8xf32> -> vector<2x8x8xf32>
    %cst_42 = arith.constant 0.353553385 : f32
    %121 = vector.broadcast %cst_42 : f32 to vector<2x8x8xf32>
    %122 = arith.mulf %120, %121 : vector<2x8x8xf32>
    %123 = vector.broadcast %25 : vector<2x1x8xf32> to vector<2x8x8xf32>
    %124 = arith.addf %122, %123 : vector<2x8x8xf32>
    %cst_43 = arith.constant dense<0xFF800000> : vector<2x8xf32>
    %125 = vector.multi_reduction <maximumf>, %124, %cst_43 [2] : vector<2x8x8xf32> to vector<2x8xf32>
    %126 = vector.shape_cast %125 : vector<2x8xf32> to vector<2x8x1xf32>
    %127 = vector.broadcast %126 : vector<2x8x1xf32> to vector<2x8x8xf32>
    %128 = arith.subf %124, %127 : vector<2x8x8xf32>
    %129 = math.exp %128 : vector<2x8x8xf32>
    %cst_44 = arith.constant dense<0.000000e+00> : vector<2x8xf32>
    %130 = vector.multi_reduction <add>, %129, %cst_44 [2] : vector<2x8x8xf32> to vector<2x8xf32>
    %131 = vector.shape_cast %130 : vector<2x8xf32> to vector<2x8x1xf32>
    %132 = tpu.reciprocal %131 {approx = true} : vector<2x8x1xf32> -> vector<2x8x1xf32>
    %133 = vector.broadcast %132 : vector<2x8x1xf32> to vector<2x8x8xf32>
    %134 = arith.mulf %129, %133 : vector<2x8x8xf32>
    %cst_45 = arith.constant dense<0.000000e+00> : vector<2x8x8xf32>
    %135 = tpu.matmul %134, %119, %cst_45 {dimension_numbers = #tpu.dot_dimension_numbers<[2], [1], [1], [2], [0, 0, 0, 1, 1, 2], [0], [0]>} : vector<2x8x8xf32>, vector<2x8x8xf32>, vector<2x8x8xf32> -> vector<2x8x8xf32>
    %136 = vector.shape_cast %135 : vector<2x8x8xf32> to vector<16x8xf32>
    %137 = vector.extract_strided_slice %34 {offsets = [24, 0], sizes = [8, 32], strides = [1, 1]} : vector<32x32xf32> to vector<8x32xf32>
    %cst_46 = arith.constant dense<0.000000e+00> : vector<16x32xf32>
    %138 = tpu.matmul %136, %137, %cst_46 {dimension_numbers = #tpu.dot_dimension_numbers<[1], [0], [0], [1], [0, 0, 1, 1], [], []>} : vector<16x8xf32>, vector<8x32xf32>, vector<16x32xf32> -> vector<16x32xf32>
    %139 = arith.addf %113, %138 : vector<16x32xf32>
    %c0_47 = arith.constant 0 : index
    %c0_48 = arith.constant 0 : index
    %c0_49 = arith.constant 0 : index
    %140 = vector.load %arg7[%c0_47, %c0_48, %c0_49] : memref<2x1x32xf32, #tpu.memory_space<vmem>>, vector<1x1x32xf32>
    %141 = vector.shape_cast %140 : vector<1x1x32xf32> to vector<1x32xf32>
    %142 = vector.broadcast %141 : vector<1x32xf32> to vector<16x32xf32>
    %143 = arith.addf %139, %142 : vector<16x32xf32>
    %144 = arith.addf %143, %24 : vector<16x32xf32>
    %c0_50 = arith.constant 0 : index
    %c0_51 = arith.constant 0 : index
    %c0_52 = arith.constant 0 : index
    %145 = vector.load %arg8[%c0_50, %c0_51, %c0_52] : memref<2x1x32xf32, #tpu.memory_space<vmem>>, vector<1x1x32xf32>
    %146 = vector.shape_cast %145 : vector<1x1x32xf32> to vector<1x32xf32>
    %c0_53 = arith.constant 0 : index
    %c0_54 = arith.constant 0 : index
    %c0_55 = arith.constant 0 : index
    %147 = vector.load %arg9[%c0_53, %c0_54, %c0_55] : memref<2x1x32xf32, #tpu.memory_space<vmem>>, vector<1x1x32xf32>
    %148 = vector.shape_cast %147 : vector<1x1x32xf32> to vector<1x32xf32>
    %cst_56 = arith.constant dense<0.000000e+00> : vector<16xf32>
    %149 = vector.multi_reduction <add>, %144, %cst_56 [1] : vector<16x32xf32> to vector<16xf32>
    %150 = vector.shape_cast %149 : vector<16xf32> to vector<16x1xf32>
    %cst_57 = arith.constant 3.200000e+01 : f32
    %151 = vector.broadcast %cst_57 : f32 to vector<16x1xf32>
    %152 = arith.divf %150, %151 : vector<16x1xf32>
    %153 = vector.broadcast %152 : vector<16x1xf32> to vector<16x32xf32>
    %154 = arith.subf %144, %153 : vector<16x32xf32>
    %155 = arith.mulf %154, %154 : vector<16x32xf32>
    %cst_58 = arith.constant dense<0.000000e+00> : vector<16xf32>
    %156 = vector.multi_reduction <add>, %155, %cst_58 [1] : vector<16x32xf32> to vector<16xf32>
    %157 = vector.shape_cast %156 : vector<16xf32> to vector<16x1xf32>
    %cst_59 = arith.constant 3.200000e+01 : f32
    %158 = vector.broadcast %cst_59 : f32 to vector<16x1xf32>
    %159 = arith.divf %157, %158 : vector<16x1xf32>
    %160 = vector.broadcast %152 : vector<16x1xf32> to vector<16x32xf32>
    %161 = arith.subf %144, %160 : vector<16x32xf32>
    %cst_60 = arith.constant 9.99999996E-13 : f32
    %162 = vector.broadcast %cst_60 : f32 to vector<16x1xf32>
    %163 = arith.addf %159, %162 : vector<16x1xf32>
    %164 = math.rsqrt %163 : vector<16x1xf32>
    %165 = vector.broadcast %164 : vector<16x1xf32> to vector<16x32xf32>
    %166 = arith.mulf %161, %165 : vector<16x32xf32>
    %167 = vector.broadcast %146 : vector<1x32xf32> to vector<16x32xf32>
    %168 = arith.mulf %166, %167 : vector<16x32xf32>
    %169 = vector.broadcast %148 : vector<1x32xf32> to vector<16x32xf32>
    %170 = arith.addf %168, %169 : vector<16x32xf32>
    %c0_61 = arith.constant 0 : index
    %c0_62 = arith.constant 0 : index
    %c0_63 = arith.constant 0 : index
    %171 = vector.load %arg10[%c0_61, %c0_62, %c0_63] : memref<2x32x64xf32, #tpu.memory_space<vmem>>, vector<1x32x64xf32>
    %172 = vector.shape_cast %171 : vector<1x32x64xf32> to vector<32x64xf32>
    %cst_64 = arith.constant dense<0.000000e+00> : vector<16x64xf32>
    %173 = tpu.matmul %170, %172, %cst_64 {dimension_numbers = #tpu.dot_dimension_numbers<[1], [0], [0], [1], [0, 0, 1, 1], [], []>} : vector<16x32xf32>, vector<32x64xf32>, vector<16x64xf32> -> vector<16x64xf32>
    %c0_65 = arith.constant 0 : index
    %c0_66 = arith.constant 0 : index
    %c0_67 = arith.constant 0 : index
    %174 = vector.load %arg11[%c0_65, %c0_66, %c0_67] : memref<2x1x64xf32, #tpu.memory_space<vmem>>, vector<1x1x64xf32>
    %175 = vector.shape_cast %174 : vector<1x1x64xf32> to vector<1x64xf32>
    %176 = vector.broadcast %175 : vector<1x64xf32> to vector<16x64xf32>
    %177 = arith.addf %173, %176 : vector<16x64xf32>
    %cst_68 = arith.constant 5.000000e-01 : f32
    %178 = vector.broadcast %cst_68 : f32 to vector<16x64xf32>
    %179 = arith.mulf %178, %177 : vector<16x64xf32>
    %cst_69 = arith.constant 4.471500e-02 : f32
    %180 = vector.broadcast %cst_69 : f32 to vector<16x64xf32>
    %181 = arith.mulf %180, %177 : vector<16x64xf32>
    %182 = arith.mulf %181, %177 : vector<16x64xf32>
    %183 = arith.mulf %182, %177 : vector<16x64xf32>
    %184 = arith.addf %177, %183 : vector<16x64xf32>
    %cst_70 = arith.constant 0.797884583 : f32
    %185 = vector.broadcast %cst_70 : f32 to vector<16x64xf32>
    %186 = arith.mulf %185, %184 : vector<16x64xf32>
    %187 = math.tanh %186 : vector<16x64xf32>
    %cst_71 = arith.constant 1.000000e+00 : f32
    %188 = vector.broadcast %cst_71 : f32 to vector<16x64xf32>
    %189 = arith.addf %188, %187 : vector<16x64xf32>
    %190 = arith.mulf %179, %189 : vector<16x64xf32>
    %c0_72 = arith.constant 0 : index
    %c0_73 = arith.constant 0 : index
    %c0_74 = arith.constant 0 : index
    %191 = vector.load %arg12[%c0_72, %c0_73, %c0_74] : memref<2x64x32xf32, #tpu.memory_space<vmem>>, vector<1x64x32xf32>
    %192 = vector.shape_cast %191 : vector<1x64x32xf32> to vector<64x32xf32>
    %cst_75 = arith.constant dense<0.000000e+00> : vector<16x32xf32>
    %193 = tpu.matmul %190, %192, %cst_75 {dimension_numbers = #tpu.dot_dimension_numbers<[1], [0], [0], [1], [0, 0, 1, 1], [], []>} : vector<16x64xf32>, vector<64x32xf32>, vector<16x32xf32> -> vector<16x32xf32>
    %c0_76 = arith.constant 0 : index
    %c0_77 = arith.constant 0 : index
    %c0_78 = arith.constant 0 : index
    %194 = vector.load %arg13[%c0_76, %c0_77, %c0_78] : memref<2x1x32xf32, #tpu.memory_space<vmem>>, vector<1x1x32xf32>
    %195 = vector.shape_cast %194 : vector<1x1x32xf32> to vector<1x32xf32>
    %196 = vector.broadcast %195 : vector<1x32xf32> to vector<16x32xf32>
    %197 = arith.addf %193, %196 : vector<16x32xf32>
    %198 = arith.addf %197, %170 : vector<16x32xf32>
    %c0_79 = arith.constant 0 : index
    %c0_80 = arith.constant 0 : index
    %c0_81 = arith.constant 0 : index
    %199 = vector.load %arg14[%c0_79, %c0_80, %c0_81] : memref<2x1x32xf32, #tpu.memory_space<vmem>>, vector<1x1x32xf32>
    %200 = vector.shape_cast %199 : vector<1x1x32xf32> to vector<1x32xf32>
    %c0_82 = arith.constant 0 : index
    %c0_83 = arith.constant 0 : index
    %c0_84 = arith.constant 0 : index
    %201 = vector.load %arg15[%c0_82, %c0_83, %c0_84] : memref<2x1x32xf32, #tpu.memory_space<vmem>>, vector<1x1x32xf32>
    %202 = vector.shape_cast %201 : vector<1x1x32xf32> to vector<1x32xf32>
    %cst_85 = arith.constant dense<0.000000e+00> : vector<16xf32>
    %203 = vector.multi_reduction <add>, %198, %cst_85 [1] : vector<16x32xf32> to vector<16xf32>
    %204 = vector.shape_cast %203 : vector<16xf32> to vector<16x1xf32>
    %cst_86 = arith.constant 3.200000e+01 : f32
    %205 = vector.broadcast %cst_86 : f32 to vector<16x1xf32>
    %206 = arith.divf %204, %205 : vector<16x1xf32>
    %207 = vector.broadcast %206 : vector<16x1xf32> to vector<16x32xf32>
    %208 = arith.subf %198, %207 : vector<16x32xf32>
    %209 = arith.mulf %208, %208 : vector<16x32xf32>
    %cst_87 = arith.constant dense<0.000000e+00> : vector<16xf32>
    %210 = vector.multi_reduction <add>, %209, %cst_87 [1] : vector<16x32xf32> to vector<16xf32>
    %211 = vector.shape_cast %210 : vector<16xf32> to vector<16x1xf32>
    %cst_88 = arith.constant 3.200000e+01 : f32
    %212 = vector.broadcast %cst_88 : f32 to vector<16x1xf32>
    %213 = arith.divf %211, %212 : vector<16x1xf32>
    %214 = vector.broadcast %206 : vector<16x1xf32> to vector<16x32xf32>
    %215 = arith.subf %198, %214 : vector<16x32xf32>
    %cst_89 = arith.constant 9.99999996E-13 : f32
    %216 = vector.broadcast %cst_89 : f32 to vector<16x1xf32>
    %217 = arith.addf %213, %216 : vector<16x1xf32>
    %218 = math.rsqrt %217 : vector<16x1xf32>
    %219 = vector.broadcast %218 : vector<16x1xf32> to vector<16x32xf32>
    %220 = arith.mulf %215, %219 : vector<16x32xf32>
    %221 = vector.broadcast %200 : vector<1x32xf32> to vector<16x32xf32>
    %222 = arith.mulf %220, %221 : vector<16x32xf32>
    %223 = vector.broadcast %202 : vector<1x32xf32> to vector<16x32xf32>
    %224 = arith.addf %222, %223 : vector<16x32xf32>
    %c1 = arith.constant 1 : index
    %c0_90 = arith.constant 0 : index
    %c0_91 = arith.constant 0 : index
    %225 = vector.load %arg4[%c1, %c0_90, %c0_91] : memref<2x32x96xf32, #tpu.memory_space<vmem>>, vector<1x32x96xf32>
    %226 = vector.shape_cast %225 : vector<1x32x96xf32> to vector<32x96xf32>
    %cst_92 = arith.constant dense<0.000000e+00> : vector<16x96xf32>
    %227 = tpu.matmul %224, %226, %cst_92 {dimension_numbers = #tpu.dot_dimension_numbers<[1], [0], [0], [1], [0, 0, 1, 1], [], []>} : vector<16x32xf32>, vector<32x96xf32>, vector<16x96xf32> -> vector<16x96xf32>
    %c1_93 = arith.constant 1 : index
    %c0_94 = arith.constant 0 : index
    %c0_95 = arith.constant 0 : index
    %228 = vector.load %arg5[%c1_93, %c0_94, %c0_95] : memref<2x1x96xf32, #tpu.memory_space<vmem>>, vector<1x1x96xf32>
    %229 = vector.shape_cast %228 : vector<1x1x96xf32> to vector<1x96xf32>
    %230 = vector.broadcast %229 : vector<1x96xf32> to vector<16x96xf32>
    %231 = arith.addf %227, %230 : vector<16x96xf32>
    %c1_96 = arith.constant 1 : index
    %c0_97 = arith.constant 0 : index
    %c0_98 = arith.constant 0 : index
    %232 = vector.load %arg6[%c1_96, %c0_97, %c0_98] : memref<2x32x32xf32, #tpu.memory_space<vmem>>, vector<1x32x32xf32>
    %233 = vector.shape_cast %232 : vector<1x32x32xf32> to vector<32x32xf32>
    %cst_99 = arith.constant 0.000000e+00 : f32
    %234 = vector.broadcast %cst_99 : f32 to vector<16x32xf32>
    %235 = vector.extract_strided_slice %231 {offsets = [0, 0], sizes = [16, 8], strides = [1, 1]} : vector<16x96xf32> to vector<16x8xf32>
    %236 = vector.shape_cast %235 : vector<16x8xf32> to vector<2x8x8xf32>
    %237 = vector.extract_strided_slice %231 {offsets = [0, 32], sizes = [16, 8], strides = [1, 1]} : vector<16x96xf32> to vector<16x8xf32>
    %238 = vector.shape_cast %237 : vector<16x8xf32> to vector<2x8x8xf32>
    %239 = vector.extract_strided_slice %231 {offsets = [0, 64], sizes = [16, 8], strides = [1, 1]} : vector<16x96xf32> to vector<16x8xf32>
    %240 = vector.shape_cast %239 : vector<16x8xf32> to vector<2x8x8xf32>
    %cst_100 = arith.constant dense<0.000000e+00> : vector<2x8x8xf32>
    %241 = tpu.matmul %236, %238, %cst_100 {dimension_numbers = #tpu.dot_dimension_numbers<[2], [2], [1], [1], [0, 0, 0, 1, 1, 1], [0], [0]>} : vector<2x8x8xf32>, vector<2x8x8xf32>, vector<2x8x8xf32> -> vector<2x8x8xf32>
    %cst_101 = arith.constant 0.353553385 : f32
    %242 = vector.broadcast %cst_101 : f32 to vector<2x8x8xf32>
    %243 = arith.mulf %241, %242 : vector<2x8x8xf32>
    %244 = vector.broadcast %25 : vector<2x1x8xf32> to vector<2x8x8xf32>
    %245 = arith.addf %243, %244 : vector<2x8x8xf32>
    %cst_102 = arith.constant dense<0xFF800000> : vector<2x8xf32>
    %246 = vector.multi_reduction <maximumf>, %245, %cst_102 [2] : vector<2x8x8xf32> to vector<2x8xf32>
    %247 = vector.shape_cast %246 : vector<2x8xf32> to vector<2x8x1xf32>
    %248 = vector.broadcast %247 : vector<2x8x1xf32> to vector<2x8x8xf32>
    %249 = arith.subf %245, %248 : vector<2x8x8xf32>
    %250 = math.exp %249 : vector<2x8x8xf32>
    %cst_103 = arith.constant dense<0.000000e+00> : vector<2x8xf32>
    %251 = vector.multi_reduction <add>, %250, %cst_103 [2] : vector<2x8x8xf32> to vector<2x8xf32>
    %252 = vector.shape_cast %251 : vector<2x8xf32> to vector<2x8x1xf32>
    %253 = tpu.reciprocal %252 {approx = true} : vector<2x8x1xf32> -> vector<2x8x1xf32>
    %254 = vector.broadcast %253 : vector<2x8x1xf32> to vector<2x8x8xf32>
    %255 = arith.mulf %250, %254 : vector<2x8x8xf32>
    %cst_104 = arith.constant dense<0.000000e+00> : vector<2x8x8xf32>
    %256 = tpu.matmul %255, %240, %cst_104 {dimension_numbers = #tpu.dot_dimension_numbers<[2], [1], [1], [2], [0, 0, 0, 1, 1, 2], [0], [0]>} : vector<2x8x8xf32>, vector<2x8x8xf32>, vector<2x8x8xf32> -> vector<2x8x8xf32>
    %257 = vector.shape_cast %256 : vector<2x8x8xf32> to vector<16x8xf32>
    %258 = vector.extract_strided_slice %233 {offsets = [0, 0], sizes = [8, 32], strides = [1, 1]} : vector<32x32xf32> to vector<8x32xf32>
    %cst_105 = arith.constant dense<0.000000e+00> : vector<16x32xf32>
    %259 = tpu.matmul %257, %258, %cst_105 {dimension_numbers = #tpu.dot_dimension_numbers<[1], [0], [0], [1], [0, 0, 1, 1], [], []>} : vector<16x8xf32>, vector<8x32xf32>, vector<16x32xf32> -> vector<16x32xf32>
    %260 = arith.addf %234, %259 : vector<16x32xf32>
    %261 = vector.extract_strided_slice %231 {offsets = [0, 8], sizes = [16, 8], strides = [1, 1]} : vector<16x96xf32> to vector<16x8xf32>
    %262 = vector.shape_cast %261 : vector<16x8xf32> to vector<2x8x8xf32>
    %263 = vector.extract_strided_slice %231 {offsets = [0, 40], sizes = [16, 8], strides = [1, 1]} : vector<16x96xf32> to vector<16x8xf32>
    %264 = vector.shape_cast %263 : vector<16x8xf32> to vector<2x8x8xf32>
    %265 = vector.extract_strided_slice %231 {offsets = [0, 72], sizes = [16, 8], strides = [1, 1]} : vector<16x96xf32> to vector<16x8xf32>
    %266 = vector.shape_cast %265 : vector<16x8xf32> to vector<2x8x8xf32>
    %cst_106 = arith.constant dense<0.000000e+00> : vector<2x8x8xf32>
    %267 = tpu.matmul %262, %264, %cst_106 {dimension_numbers = #tpu.dot_dimension_numbers<[2], [2], [1], [1], [0, 0, 0, 1, 1, 1], [0], [0]>} : vector<2x8x8xf32>, vector<2x8x8xf32>, vector<2x8x8xf32> -> vector<2x8x8xf32>
    %cst_107 = arith.constant 0.353553385 : f32
    %268 = vector.broadcast %cst_107 : f32 to vector<2x8x8xf32>
    %269 = arith.mulf %267, %268 : vector<2x8x8xf32>
    %270 = vector.broadcast %25 : vector<2x1x8xf32> to vector<2x8x8xf32>
    %271 = arith.addf %269, %270 : vector<2x8x8xf32>
    %cst_108 = arith.constant dense<0xFF800000> : vector<2x8xf32>
    %272 = vector.multi_reduction <maximumf>, %271, %cst_108 [2] : vector<2x8x8xf32> to vector<2x8xf32>
    %273 = vector.shape_cast %272 : vector<2x8xf32> to vector<2x8x1xf32>
    %274 = vector.broadcast %273 : vector<2x8x1xf32> to vector<2x8x8xf32>
    %275 = arith.subf %271, %274 : vector<2x8x8xf32>
    %276 = math.exp %275 : vector<2x8x8xf32>
    %cst_109 = arith.constant dense<0.000000e+00> : vector<2x8xf32>
    %277 = vector.multi_reduction <add>, %276, %cst_109 [2] : vector<2x8x8xf32> to vector<2x8xf32>
    %278 = vector.shape_cast %277 : vector<2x8xf32> to vector<2x8x1xf32>
    %279 = tpu.reciprocal %278 {approx = true} : vector<2x8x1xf32> -> vector<2x8x1xf32>
    %280 = vector.broadcast %279 : vector<2x8x1xf32> to vector<2x8x8xf32>
    %281 = arith.mulf %276, %280 : vector<2x8x8xf32>
    %cst_110 = arith.constant dense<0.000000e+00> : vector<2x8x8xf32>
    %282 = tpu.matmul %281, %266, %cst_110 {dimension_numbers = #tpu.dot_dimension_numbers<[2], [1], [1], [2], [0, 0, 0, 1, 1, 2], [0], [0]>} : vector<2x8x8xf32>, vector<2x8x8xf32>, vector<2x8x8xf32> -> vector<2x8x8xf32>
    %283 = vector.shape_cast %282 : vector<2x8x8xf32> to vector<16x8xf32>
    %284 = vector.extract_strided_slice %233 {offsets = [8, 0], sizes = [8, 32], strides = [1, 1]} : vector<32x32xf32> to vector<8x32xf32>
    %cst_111 = arith.constant dense<0.000000e+00> : vector<16x32xf32>
    %285 = tpu.matmul %283, %284, %cst_111 {dimension_numbers = #tpu.dot_dimension_numbers<[1], [0], [0], [1], [0, 0, 1, 1], [], []>} : vector<16x8xf32>, vector<8x32xf32>, vector<16x32xf32> -> vector<16x32xf32>
    %286 = arith.addf %260, %285 : vector<16x32xf32>
    %287 = vector.extract_strided_slice %231 {offsets = [0, 16], sizes = [16, 8], strides = [1, 1]} : vector<16x96xf32> to vector<16x8xf32>
    %288 = vector.shape_cast %287 : vector<16x8xf32> to vector<2x8x8xf32>
    %289 = vector.extract_strided_slice %231 {offsets = [0, 48], sizes = [16, 8], strides = [1, 1]} : vector<16x96xf32> to vector<16x8xf32>
    %290 = vector.shape_cast %289 : vector<16x8xf32> to vector<2x8x8xf32>
    %291 = vector.extract_strided_slice %231 {offsets = [0, 80], sizes = [16, 8], strides = [1, 1]} : vector<16x96xf32> to vector<16x8xf32>
    %292 = vector.shape_cast %291 : vector<16x8xf32> to vector<2x8x8xf32>
    %cst_112 = arith.constant dense<0.000000e+00> : vector<2x8x8xf32>
    %293 = tpu.matmul %288, %290, %cst_112 {dimension_numbers = #tpu.dot_dimension_numbers<[2], [2], [1], [1], [0, 0, 0, 1, 1, 1], [0], [0]>} : vector<2x8x8xf32>, vector<2x8x8xf32>, vector<2x8x8xf32> -> vector<2x8x8xf32>
    %cst_113 = arith.constant 0.353553385 : f32
    %294 = vector.broadcast %cst_113 : f32 to vector<2x8x8xf32>
    %295 = arith.mulf %293, %294 : vector<2x8x8xf32>
    %296 = vector.broadcast %25 : vector<2x1x8xf32> to vector<2x8x8xf32>
    %297 = arith.addf %295, %296 : vector<2x8x8xf32>
    %cst_114 = arith.constant dense<0xFF800000> : vector<2x8xf32>
    %298 = vector.multi_reduction <maximumf>, %297, %cst_114 [2] : vector<2x8x8xf32> to vector<2x8xf32>
    %299 = vector.shape_cast %298 : vector<2x8xf32> to vector<2x8x1xf32>
    %300 = vector.broadcast %299 : vector<2x8x1xf32> to vector<2x8x8xf32>
    %301 = arith.subf %297, %300 : vector<2x8x8xf32>
    %302 = math.exp %301 : vector<2x8x8xf32>
    %cst_115 = arith.constant dense<0.000000e+00> : vector<2x8xf32>
    %303 = vector.multi_reduction <add>, %302, %cst_115 [2] : vector<2x8x8xf32> to vector<2x8xf32>
    %304 = vector.shape_cast %303 : vector<2x8xf32> to vector<2x8x1xf32>
    %305 = tpu.reciprocal %304 {approx = true} : vector<2x8x1xf32> -> vector<2x8x1xf32>
    %306 = vector.broadcast %305 : vector<2x8x1xf32> to vector<2x8x8xf32>
    %307 = arith.mulf %302, %306 : vector<2x8x8xf32>
    %cst_116 = arith.constant dense<0.000000e+00> : vector<2x8x8xf32>
    %308 = tpu.matmul %307, %292, %cst_116 {dimension_numbers = #tpu.dot_dimension_numbers<[2], [1], [1], [2], [0, 0, 0, 1, 1, 2], [0], [0]>} : vector<2x8x8xf32>, vector<2x8x8xf32>, vector<2x8x8xf32> -> vector<2x8x8xf32>
    %309 = vector.shape_cast %308 : vector<2x8x8xf32> to vector<16x8xf32>
    %310 = vector.extract_strided_slice %233 {offsets = [16, 0], sizes = [8, 32], strides = [1, 1]} : vector<32x32xf32> to vector<8x32xf32>
    %cst_117 = arith.constant dense<0.000000e+00> : vector<16x32xf32>
    %311 = tpu.matmul %309, %310, %cst_117 {dimension_numbers = #tpu.dot_dimension_numbers<[1], [0], [0], [1], [0, 0, 1, 1], [], []>} : vector<16x8xf32>, vector<8x32xf32>, vector<16x32xf32> -> vector<16x32xf32>
    %312 = arith.addf %286, %311 : vector<16x32xf32>
    %313 = vector.extract_strided_slice %231 {offsets = [0, 24], sizes = [16, 8], strides = [1, 1]} : vector<16x96xf32> to vector<16x8xf32>
    %314 = vector.shape_cast %313 : vector<16x8xf32> to vector<2x8x8xf32>
    %315 = vector.extract_strided_slice %231 {offsets = [0, 56], sizes = [16, 8], strides = [1, 1]} : vector<16x96xf32> to vector<16x8xf32>
    %316 = vector.shape_cast %315 : vector<16x8xf32> to vector<2x8x8xf32>
    %317 = vector.extract_strided_slice %231 {offsets = [0, 88], sizes = [16, 8], strides = [1, 1]} : vector<16x96xf32> to vector<16x8xf32>
    %318 = vector.shape_cast %317 : vector<16x8xf32> to vector<2x8x8xf32>
    %cst_118 = arith.constant dense<0.000000e+00> : vector<2x8x8xf32>
    %319 = tpu.matmul %314, %316, %cst_118 {dimension_numbers = #tpu.dot_dimension_numbers<[2], [2], [1], [1], [0, 0, 0, 1, 1, 1], [0], [0]>} : vector<2x8x8xf32>, vector<2x8x8xf32>, vector<2x8x8xf32> -> vector<2x8x8xf32>
    %cst_119 = arith.constant 0.353553385 : f32
    %320 = vector.broadcast %cst_119 : f32 to vector<2x8x8xf32>
    %321 = arith.mulf %319, %320 : vector<2x8x8xf32>
    %322 = vector.broadcast %25 : vector<2x1x8xf32> to vector<2x8x8xf32>
    %323 = arith.addf %321, %322 : vector<2x8x8xf32>
    %cst_120 = arith.constant dense<0xFF800000> : vector<2x8xf32>
    %324 = vector.multi_reduction <maximumf>, %323, %cst_120 [2] : vector<2x8x8xf32> to vector<2x8xf32>
    %325 = vector.shape_cast %324 : vector<2x8xf32> to vector<2x8x1xf32>
    %326 = vector.broadcast %325 : vector<2x8x1xf32> to vector<2x8x8xf32>
    %327 = arith.subf %323, %326 : vector<2x8x8xf32>
    %328 = math.exp %327 : vector<2x8x8xf32>
    %cst_121 = arith.constant dense<0.000000e+00> : vector<2x8xf32>
    %329 = vector.multi_reduction <add>, %328, %cst_121 [2] : vector<2x8x8xf32> to vector<2x8xf32>
    %330 = vector.shape_cast %329 : vector<2x8xf32> to vector<2x8x1xf32>
    %331 = tpu.reciprocal %330 {approx = true} : vector<2x8x1xf32> -> vector<2x8x1xf32>
    %332 = vector.broadcast %331 : vector<2x8x1xf32> to vector<2x8x8xf32>
    %333 = arith.mulf %328, %332 : vector<2x8x8xf32>
    %cst_122 = arith.constant dense<0.000000e+00> : vector<2x8x8xf32>
    %334 = tpu.matmul %333, %318, %cst_122 {dimension_numbers = #tpu.dot_dimension_numbers<[2], [1], [1], [2], [0, 0, 0, 1, 1, 2], [0], [0]>} : vector<2x8x8xf32>, vector<2x8x8xf32>, vector<2x8x8xf32> -> vector<2x8x8xf32>
    %335 = vector.shape_cast %334 : vector<2x8x8xf32> to vector<16x8xf32>
    %336 = vector.extract_strided_slice %233 {offsets = [24, 0], sizes = [8, 32], strides = [1, 1]} : vector<32x32xf32> to vector<8x32xf32>
    %cst_123 = arith.constant dense<0.000000e+00> : vector<16x32xf32>
    %337 = tpu.matmul %335, %336, %cst_123 {dimension_numbers = #tpu.dot_dimension_numbers<[1], [0], [0], [1], [0, 0, 1, 1], [], []>} : vector<16x8xf32>, vector<8x32xf32>, vector<16x32xf32> -> vector<16x32xf32>
    %338 = arith.addf %312, %337 : vector<16x32xf32>
    %c1_124 = arith.constant 1 : index
    %c0_125 = arith.constant 0 : index
    %c0_126 = arith.constant 0 : index
    %339 = vector.load %arg7[%c1_124, %c0_125, %c0_126] : memref<2x1x32xf32, #tpu.memory_space<vmem>>, vector<1x1x32xf32>
    %340 = vector.shape_cast %339 : vector<1x1x32xf32> to vector<1x32xf32>
    %341 = vector.broadcast %340 : vector<1x32xf32> to vector<16x32xf32>
    %342 = arith.addf %338, %341 : vector<16x32xf32>
    %343 = arith.addf %342, %224 : vector<16x32xf32>
    %c1_127 = arith.constant 1 : index
    %c0_128 = arith.constant 0 : index
    %c0_129 = arith.constant 0 : index
    %344 = vector.load %arg8[%c1_127, %c0_128, %c0_129] : memref<2x1x32xf32, #tpu.memory_space<vmem>>, vector<1x1x32xf32>
    %345 = vector.shape_cast %344 : vector<1x1x32xf32> to vector<1x32xf32>
    %c1_130 = arith.constant 1 : index
    %c0_131 = arith.constant 0 : index
    %c0_132 = arith.constant 0 : index
    %346 = vector.load %arg9[%c1_130, %c0_131, %c0_132] : memref<2x1x32xf32, #tpu.memory_space<vmem>>, vector<1x1x32xf32>
    %347 = vector.shape_cast %346 : vector<1x1x32xf32> to vector<1x32xf32>
    %cst_133 = arith.constant dense<0.000000e+00> : vector<16xf32>
    %348 = vector.multi_reduction <add>, %343, %cst_133 [1] : vector<16x32xf32> to vector<16xf32>
    %349 = vector.shape_cast %348 : vector<16xf32> to vector<16x1xf32>
    %cst_134 = arith.constant 3.200000e+01 : f32
    %350 = vector.broadcast %cst_134 : f32 to vector<16x1xf32>
    %351 = arith.divf %349, %350 : vector<16x1xf32>
    %352 = vector.broadcast %351 : vector<16x1xf32> to vector<16x32xf32>
    %353 = arith.subf %343, %352 : vector<16x32xf32>
    %354 = arith.mulf %353, %353 : vector<16x32xf32>
    %cst_135 = arith.constant dense<0.000000e+00> : vector<16xf32>
    %355 = vector.multi_reduction <add>, %354, %cst_135 [1] : vector<16x32xf32> to vector<16xf32>
    %356 = vector.shape_cast %355 : vector<16xf32> to vector<16x1xf32>
    %cst_136 = arith.constant 3.200000e+01 : f32
    %357 = vector.broadcast %cst_136 : f32 to vector<16x1xf32>
    %358 = arith.divf %356, %357 : vector<16x1xf32>
    %359 = vector.broadcast %351 : vector<16x1xf32> to vector<16x32xf32>
    %360 = arith.subf %343, %359 : vector<16x32xf32>
    %cst_137 = arith.constant 9.99999996E-13 : f32
    %361 = vector.broadcast %cst_137 : f32 to vector<16x1xf32>
    %362 = arith.addf %358, %361 : vector<16x1xf32>
    %363 = math.rsqrt %362 : vector<16x1xf32>
    %364 = vector.broadcast %363 : vector<16x1xf32> to vector<16x32xf32>
    %365 = arith.mulf %360, %364 : vector<16x32xf32>
    %366 = vector.broadcast %345 : vector<1x32xf32> to vector<16x32xf32>
    %367 = arith.mulf %365, %366 : vector<16x32xf32>
    %368 = vector.broadcast %347 : vector<1x32xf32> to vector<16x32xf32>
    %369 = arith.addf %367, %368 : vector<16x32xf32>
    %c1_138 = arith.constant 1 : index
    %c0_139 = arith.constant 0 : index
    %c0_140 = arith.constant 0 : index
    %370 = vector.load %arg10[%c1_138, %c0_139, %c0_140] : memref<2x32x64xf32, #tpu.memory_space<vmem>>, vector<1x32x64xf32>
    %371 = vector.shape_cast %370 : vector<1x32x64xf32> to vector<32x64xf32>
    %cst_141 = arith.constant dense<0.000000e+00> : vector<16x64xf32>
    %372 = tpu.matmul %369, %371, %cst_141 {dimension_numbers = #tpu.dot_dimension_numbers<[1], [0], [0], [1], [0, 0, 1, 1], [], []>} : vector<16x32xf32>, vector<32x64xf32>, vector<16x64xf32> -> vector<16x64xf32>
    %c1_142 = arith.constant 1 : index
    %c0_143 = arith.constant 0 : index
    %c0_144 = arith.constant 0 : index
    %373 = vector.load %arg11[%c1_142, %c0_143, %c0_144] : memref<2x1x64xf32, #tpu.memory_space<vmem>>, vector<1x1x64xf32>
    %374 = vector.shape_cast %373 : vector<1x1x64xf32> to vector<1x64xf32>
    %375 = vector.broadcast %374 : vector<1x64xf32> to vector<16x64xf32>
    %376 = arith.addf %372, %375 : vector<16x64xf32>
    %cst_145 = arith.constant 5.000000e-01 : f32
    %377 = vector.broadcast %cst_145 : f32 to vector<16x64xf32>
    %378 = arith.mulf %377, %376 : vector<16x64xf32>
    %cst_146 = arith.constant 4.471500e-02 : f32
    %379 = vector.broadcast %cst_146 : f32 to vector<16x64xf32>
    %380 = arith.mulf %379, %376 : vector<16x64xf32>
    %381 = arith.mulf %380, %376 : vector<16x64xf32>
    %382 = arith.mulf %381, %376 : vector<16x64xf32>
    %383 = arith.addf %376, %382 : vector<16x64xf32>
    %cst_147 = arith.constant 0.797884583 : f32
    %384 = vector.broadcast %cst_147 : f32 to vector<16x64xf32>
    %385 = arith.mulf %384, %383 : vector<16x64xf32>
    %386 = math.tanh %385 : vector<16x64xf32>
    %cst_148 = arith.constant 1.000000e+00 : f32
    %387 = vector.broadcast %cst_148 : f32 to vector<16x64xf32>
    %388 = arith.addf %387, %386 : vector<16x64xf32>
    %389 = arith.mulf %378, %388 : vector<16x64xf32>
    %c1_149 = arith.constant 1 : index
    %c0_150 = arith.constant 0 : index
    %c0_151 = arith.constant 0 : index
    %390 = vector.load %arg12[%c1_149, %c0_150, %c0_151] : memref<2x64x32xf32, #tpu.memory_space<vmem>>, vector<1x64x32xf32>
    %391 = vector.shape_cast %390 : vector<1x64x32xf32> to vector<64x32xf32>
    %cst_152 = arith.constant dense<0.000000e+00> : vector<16x32xf32>
    %392 = tpu.matmul %389, %391, %cst_152 {dimension_numbers = #tpu.dot_dimension_numbers<[1], [0], [0], [1], [0, 0, 1, 1], [], []>} : vector<16x64xf32>, vector<64x32xf32>, vector<16x32xf32> -> vector<16x32xf32>
    %c1_153 = arith.constant 1 : index
    %c0_154 = arith.constant 0 : index
    %c0_155 = arith.constant 0 : index
    %393 = vector.load %arg13[%c1_153, %c0_154, %c0_155] : memref<2x1x32xf32, #tpu.memory_space<vmem>>, vector<1x1x32xf32>
    %394 = vector.shape_cast %393 : vector<1x1x32xf32> to vector<1x32xf32>
    %395 = vector.broadcast %394 : vector<1x32xf32> to vector<16x32xf32>
    %396 = arith.addf %392, %395 : vector<16x32xf32>
    %397 = arith.addf %396, %369 : vector<16x32xf32>
    %c1_156 = arith.constant 1 : index
    %c0_157 = arith.constant 0 : index
    %c0_158 = arith.constant 0 : index
    %398 = vector.load %arg14[%c1_156, %c0_157, %c0_158] : memref<2x1x32xf32, #tpu.memory_space<vmem>>, vector<1x1x32xf32>
    %399 = vector.shape_cast %398 : vector<1x1x32xf32> to vector<1x32xf32>
    %c1_159 = arith.constant 1 : index
    %c0_160 = arith.constant 0 : index
    %c0_161 = arith.constant 0 : index
    %400 = vector.load %arg15[%c1_159, %c0_160, %c0_161] : memref<2x1x32xf32, #tpu.memory_space<vmem>>, vector<1x1x32xf32>
    %401 = vector.shape_cast %400 : vector<1x1x32xf32> to vector<1x32xf32>
    %cst_162 = arith.constant dense<0.000000e+00> : vector<16xf32>
    %402 = vector.multi_reduction <add>, %397, %cst_162 [1] : vector<16x32xf32> to vector<16xf32>
    %403 = vector.shape_cast %402 : vector<16xf32> to vector<16x1xf32>
    %cst_163 = arith.constant 3.200000e+01 : f32
    %404 = vector.broadcast %cst_163 : f32 to vector<16x1xf32>
    %405 = arith.divf %403, %404 : vector<16x1xf32>
    %406 = vector.broadcast %405 : vector<16x1xf32> to vector<16x32xf32>
    %407 = arith.subf %397, %406 : vector<16x32xf32>
    %408 = arith.mulf %407, %407 : vector<16x32xf32>
    %cst_164 = arith.constant dense<0.000000e+00> : vector<16xf32>
    %409 = vector.multi_reduction <add>, %408, %cst_164 [1] : vector<16x32xf32> to vector<16xf32>
    %410 = vector.shape_cast %409 : vector<16xf32> to vector<16x1xf32>
    %cst_165 = arith.constant 3.200000e+01 : f32
    %411 = vector.broadcast %cst_165 : f32 to vector<16x1xf32>
    %412 = arith.divf %410, %411 : vector<16x1xf32>
    %413 = vector.broadcast %405 : vector<16x1xf32> to vector<16x32xf32>
    %414 = arith.subf %397, %413 : vector<16x32xf32>
    %cst_166 = arith.constant 9.99999996E-13 : f32
    %415 = vector.broadcast %cst_166 : f32 to vector<16x1xf32>
    %416 = arith.addf %412, %415 : vector<16x1xf32>
    %417 = math.rsqrt %416 : vector<16x1xf32>
    %418 = vector.broadcast %417 : vector<16x1xf32> to vector<16x32xf32>
    %419 = arith.mulf %414, %418 : vector<16x32xf32>
    %420 = vector.broadcast %399 : vector<1x32xf32> to vector<16x32xf32>
    %421 = arith.mulf %419, %420 : vector<16x32xf32>
    %422 = vector.broadcast %401 : vector<1x32xf32> to vector<16x32xf32>
    %423 = arith.addf %421, %422 : vector<16x32xf32>
    %424 = vector.shape_cast %423 : vector<16x32xf32> to vector<2x8x32xf32>
    %425 = vector.extract_strided_slice %424 {offsets = [0, 0, 0], sizes = [2, 1, 32], strides = [1, 1, 1]} : vector<2x8x32xf32> to vector<2x1x32xf32>
    %426 = vector.shape_cast %425 : vector<2x1x32xf32> to vector<2x32xf32>
    %c0_167 = arith.constant 0 : index
    %c0_168 = arith.constant 0 : index
    %427 = vector.load %arg16[%c0_167, %c0_168] : memref<32x32xf32, #tpu.memory_space<vmem>>, vector<32x32xf32>
    %cst_169 = arith.constant dense<0.000000e+00> : vector<2x32xf32>
    %428 = tpu.matmul %426, %427, %cst_169 {dimension_numbers = #tpu.dot_dimension_numbers<[1], [0], [0], [1], [0, 0, 1, 1], [], []>} : vector<2x32xf32>, vector<32x32xf32>, vector<2x32xf32> -> vector<2x32xf32>
    %c0_170 = arith.constant 0 : index
    %c0_171 = arith.constant 0 : index
    %429 = vector.load %arg17[%c0_170, %c0_171] : memref<1x32xf32, #tpu.memory_space<vmem>>, vector<1x32xf32>
    %430 = vector.broadcast %429 : vector<1x32xf32> to vector<2x32xf32>
    %431 = arith.addf %428, %430 : vector<2x32xf32>
    %432 = math.tanh %431 : vector<2x32xf32>
    %c0_172 = arith.constant 0 : index
    %c0_173 = arith.constant 0 : index
    %433 = vector.load %arg18[%c0_172, %c0_173] : memref<32x1xf32, #tpu.memory_space<vmem>>, vector<32x1xf32>
    %cst_174 = arith.constant dense<0.000000e+00> : vector<2x1xf32>
    %434 = tpu.matmul %432, %433, %cst_174 {dimension_numbers = #tpu.dot_dimension_numbers<[1], [0], [0], [1], [0, 0, 1, 1], [], []>} : vector<2x32xf32>, vector<32x1xf32>, vector<2x1xf32> -> vector<2x1xf32>
    %c0_175 = arith.constant 0 : index
    %c0_176 = arith.constant 0 : index
    %435 = vector.load %arg19[%c0_175, %c0_176] : memref<1x1xf32, #tpu.memory_space<vmem>>, vector<1x1xf32>
    %436 = vector.broadcast %435 : vector<1x1xf32> to vector<2x1xf32>
    %437 = arith.addf %434, %436 : vector<2x1xf32>
    %cst_177 = arith.constant 0.000000e+00 : f32
    %438 = vector.broadcast %cst_177 : f32 to vector<2x1xf32>
    %439 = arith.subf %438, %437 : vector<2x1xf32>
    %440 = math.exp %439 : vector<2x1xf32>
    %cst_178 = arith.constant 1.000000e+00 : f32
    %441 = vector.broadcast %cst_178 : f32 to vector<2x1xf32>
    %442 = arith.addf %441, %440 : vector<2x1xf32>
    %443 = tpu.reciprocal %442 {approx = true} : vector<2x1xf32> -> vector<2x1xf32>
    %c0_179 = arith.constant 0 : index
    %c0_180 = arith.constant 0 : index
    %444 = vector.load %arg20[%c0_179, %c0_180] : memref<2x1xf32, #tpu.memory_space<vmem>>, vector<2x1xf32>
    tpu.vector_store %arg20[%c0_179, %c0_180], %443 {strides = array<i32>} : memref<2x1xf32, #tpu.memory_space<vmem>>, vector<2x1xf32>,
    return
  }
}

</mosaic_0001>

<bundles_post_ra>
// kernel: bert_ir_forward.1
= control target key start
LH: loop header
LB: loop body
LE: loop exit
PB: predicated region body
PF: predicated region fallthrough
CT: control target
= control target key end

     0   :  { %vm71_vm0 = vcmask 261120   ;;  %v5144_v34 = vmov 0.0   ;;  %vm5145_vm1 = vmmov 0   ;;  %s5146_s28 = smov 96   ;;  %vm216_vm2 = vcmask 64512   ;;  %s5147_s21 = smov 64   ;;  %s5901_s0 = inlined_call_operand.vmem [shape: f32[16,32], index: 0, kind: input, shape index: {}]   ;;  %s5902_s4 = inlined_call_operand.vmem [shape: f32[2,32,96], index: 4, kind: input, shape index: {}]   ;;  %s5903_s2 = inlined_call_operand.vmem [shape: f32[1,32], index: 2, kind: input, shape index: {}]   ;;  %s5904_s3 = inlined_call_operand.vmem [shape: f32[1,32], index: 3, kind: input, shape index: {}]   ;;  %s5905_s5 = inlined_call_operand.vmem [shape: f32[2,1,96], index: 5, kind: input, shape index: {}]   ;;  %s5906_s1 = inlined_call_operand.vmem [shape: f32[2,1,8], index: 1, kind: input, shape index: {}]   ;;  %s5907_s6 = inlined_call_operand.vmem [shape: f32[2,32,32], index: 6, kind: input, shape index: {}]   ;;  %s5908_s7 = inlined_call_operand.vmem [shape: f32[2,1,32], index: 7, kind: input, shape index: {}]   ;;  %s5909_s10 = inlined_call_operand.vmem [shape: f32[2,32,64], index: 10, kind: input, shape index: {}]   ;;  %s5910_s8 = inlined_call_operand.vmem [shape: f32[2,1,32], index: 8, kind: input, shape index: {}]   ;;  %s5911_s9 = inlined_call_operand.vmem [shape: f32[2,1,32], index: 9, kind: input, shape index: {}]   ;;  %s5912_s12 = inlined_call_operand.vmem [shape: f32[2,64,32], index: 12, kind: input, shape index: {}]   ;;  %s5913_s11 = inlined_call_operand.vmem [shape: f32[2,1,64], index: 11, kind: input, shape index: {}]   ;;  %s5914_s13 = inlined_call_operand.vmem [shape: f32[2,1,32], index: 13, kind: input, shape index: {}]   ;;  %s5915_s14 = inlined_call_operand.vmem [shape: f32[2,1,32], index: 14, kind: input, shape index: {}]   ;;  %s5916_s15 = inlined_call_operand.vmem [shape: f32[2,1,32], index: 15, kind: input, shape index: {}]   ;;  %s5917_s16 = inlined_call_operand.vmem [shape: f32[32,32], index: 16, kind: input, shape index: {}]   ;;  %s5918_s18 = inlined_call_operand.vmem [shape: f32[32,1], index: 18, kind: input, shape index: {}]   ;;  %s5919_s19 = inlined_call_operand.<no memory space> [shape: f32[1,1], index: 19, kind: input, shape index: {}]   ;;  %s5920_s17 = inlined_call_operand.vmem [shape: f32[1,32], index: 17, kind: input, shape index: {}]   ;;  %s5921_s20 = inlined_call_operand.vmem [shape: f32[2,1], index: 20, kind: output, shape index: {}]  }
   0x1   :  { %5937 = sst [smem:[#allocation3_spill]] %s5901_s0  ;;  %4738 = vmatprep.subr.mxu1 %v5144_v34  ;;  %4740 = vmatprep.mubr.msk.f32.mxu1 %vm5145_vm1, %v5144_v34  ;;  %v5330_v43 = vld [vmem:[%s5906_s1] ss:$0 sm:$0xff]  ;;  %v5336_v48 = vld [vmem:[%s5906_s1 + $0x1] ss:$0 sm:$0xff]  ;;  %s5935_s24 = smov 80  }
   0x2   :  { %5938 = sst [smem:[#allocation4_spill]] %s5902_s4  ;;  %s5148_s4 = smov 88   ;;  %vm2068_vm3 = vcmask 523264   ;;  %vm4287_vm4 = vcmask 1041409   ;;  %vm4451_vm5 = vcmask 1024  }
   0x3   :  { %5939 = sst [smem:[#allocation5_spill]] %s5903_s2  ;;  %s5931_s30 = smov 48  }
   0x4   :  { %5940 = sst [smem:[#allocation6_spill]] %s5904_s3  ;;  %s5929_s0 = smov 72  }
   0x5   :  { %5941 = sst [smem:[#allocation7_spill]] %s5905_s5  ;;  %s5927_s25 = smov 104  }
   0x6   :  { %s5942_s23 = sld [smem:[#allocation3_spill]]  ;;  %s5925_s29 = smov 40  }
   0x7   :  { %s5943_s26 = sld [smem:[#allocation4_spill]] }
   0x8   :  { %s5944_s22 = sld [smem:[#allocation5_spill]] }
   0x9   :  { %s5945_s2 = sld [smem:[#allocation6_spill]] }
   0xa   :  { %s5946_s27 = sld [smem:[#allocation7_spill]] }
   0xc   :  { %v67_v0 = vld [vmem:[%s5942_s23] sm:$0xff]  ;;  %v68_v1 = vld [vmem:[%s5942_s23 + $0x8] sm:$0xff]  ;;  %s5150_s23 = smov 56  }
   0xd   :  { %v72_v2 = vsel %vm71_vm0, %v67_v0, 0.0  ;;  %v75_v3 = vsel %vm71_vm0, %v68_v1, 0.0  ;;  %v120_v14 = vld [vmem:[%s5943_s26 + $0x18] sm:$0xff]  ;;  %v119_v15 = vld [vmem:[%s5943_s26 + $0x10] sm:$0xff]  ;;  %v118_v16 = vld [vmem:[%s5943_s26 + $0x8] sm:$0xff] }
   0xe   :  { %73 = vadd.xlane.f32.xlu0 %v72_v2  ;;  %4727 = vmatprep.subr.mxu0 %v120_v14  ;;  %v117_v17 = vld [vmem:[%s5943_s26] sm:$0xff] }
   0xf   :  { %4728 = vmatpush3.msra.mxu0 %v120_v14  ;;  %v4457_v25 = vld [vmem:[%s5944_s22] ss:$0 sm:$0xff]  ;;  %s5149_s22 = smov 120  }
  0x10   :  { %4729 = vmatprep.subr.mxu0 %v119_v15  ;;  %v4458_v27 = vld [vmem:[%s5945_s2] ss:$0 sm:$0xff]  ;;  %s5933_s2 = smov 112  }
  0x11   :  { %4730 = vmatpush3.msra.mxu0 %v119_v15  ;;  %v4459_v35 = vld [vmem:[%s5946_s27] ss:$0 sm:$0xff] }
  0x12   :  { %76 = vadd.xlane.f32.xlu0 %v75_v3  ;;  %4731 = vmatprep.subr.mxu0 %v118_v16 }
  0x13   :  { %4732 = vmatpush3.msra.mxu0 %v118_v16 }
  0x14   :  { %4733 = vmatprep.subr.mxu0 %v117_v17 }
  0x15   :  { %4734 = vmatpush3.msra.mxu0 %v117_v17 }
  0x16   :  { %4758 = vmatprep.subr.mxu0 %v5144_v34 }
  0x97   :  { %v74_v4 = vpop.xlane.xlu0 %73 }
  0x98   :  { %v79_v5 = vmul.f32 0.03125, %v74_v4 }
  0x9a   :  { %v81_v6 = vsub.f32 %v67_v0, %v79_v5 }
  0x9b   :  { %v77_v7 = vpop.xlane.xlu0 %76 }
  0x9c   :  { %v80_v8 = vmul.f32 0.03125, %v77_v7  ;;  %v83_v9 = vmul.f32 %v81_v6, %v81_v6 }
  0x9e   :  { %v82_v10 = vsub.f32 %v68_v1, %v80_v8  ;;  %v85_v11 = vsel %vm71_vm0, %v83_v9, 0.0 }
  0x9f   :  { %86 = vadd.xlane.f32.xlu1 %v85_v11 }
  0xa0   :  { %v84_v12 = vmul.f32 %v82_v10, %v82_v10 }
  0xa2   :  { %v88_v13 = vsel %vm71_vm0, %v84_v12, 0.0 }
  0xa3   :  { %89 = vadd.xlane.f32.xlu1 %v88_v13 }
 0x128   :  { %v87_v18 = vpop.xlane.xlu1 %86 }
 0x129   :  { %v91_v19 = vmul.f32 0.03125, %v87_v18 }
 0x12b   :  { %v93_v20 = vadd.f32 1e-12, %v91_v19 }
 0x12c   :  { %v90_v21 = vpop.xlane.xlu1 %89 }
 0x12d   :  { %5044 = vrsqrt.f32 %v93_v20  ;;  %v92_v22 = vmul.f32 0.03125, %v90_v21 }
 0x12f   :  { %v94_v23 = vadd.f32 1e-12, %v92_v22 }
 0x131   :  { %5046 = vrsqrt.f32 %v94_v23 }
 0x13a   :  { %v5045_v24 = vpop.eup %5044 }
 0x13b   :  { %v97_v26 = vmul.f32 %v5045_v24, %v81_v6 }
 0x13d   :  { %v105_v28 = vmul.f32 %v4457_v25, %v97_v26 }
 0x13e   :  { %v5047_v29 = vpop.eup %5046 }
 0x13f   :  { %v98_v30 = vmul.f32 %v5047_v29, %v82_v10  ;;  %v5290_v31 = vadd.f32 %v4458_v27, %v105_v28 }
 0x141   :  { %v106_v32 = vmul.f32 %v4457_v25, %v98_v30  ;;  %4735 = vmatprep.mubr.msk.f32.mxu0 %vm71_vm0, %v5290_v31 }
 0x143   :  { %v5294_v33 = vadd.f32 %v4458_v27, %v106_v32 }
 0x145   :  { %4736 = vmatmul.mubr.msk.f32.vlgmr.msra.gmra.mxu0 %vm71_vm0, %v5294_v33 }
 0x146   :  { %4760 = vmatprep.mubr.msk.f32.mxu0 %vm5145_vm1, %v5144_v34 }
 0x205   :  { %v4737_v36 = vpop.f32.mrf.mxu0 }
 0x206   :  { %v5307_v37 = vadd.f32 %v4737_v36, %v4459_v35 }
 0x207   :  { %v200_v38 = vpop.f32.mrf.mxu0 }
 0x208   :  { %v5309_v39 = vadd.f32 %v4459_v35, %v200_v38  ;;  %292 = vrot.lane.b32.xlu1 %v5307_v37, %s5146_s28 }
 0x20a   :  { %214 = vrot.lane.b32.xlu0 %v5309_v39, %s5146_s28 }
 0x27a   :  { %v293_v41 = vpop.permute.xlu1 %292 }
 0x27c   :  { %v215_v40 = vpop.permute.xlu0 %214 }
 0x27d   :  { %4739 = vmatpush3.xpose.msk.msra.mxu1 %vm216_vm2, %v215_v40 }
 0x27e   :  { %4743 = vmatprep.subr.mxu1 %v5144_v34 }
 0x280   :  { %4741 = vmatmul.mubr.msk.f32.vlgmr.msra.gmra.mxu1 %vm216_vm2, %v5309_v39 }
 0x281   :  { %4744 = vmatpush3.xpose.msk.msra.mxu1 %vm216_vm2, %v293_v41  ;;  %4745 = vmatprep.mubr.msk.f32.mxu1 %vm5145_vm1, %v5144_v34 }
 0x282   :  { %4748 = vmatprep.subr.mxu1 %v5144_v34 }
 0x284   :  { %4746 = vmatmul.mubr.msk.f32.vlgmr.msra.gmra.mxu1 %vm216_vm2, %v5307_v37 }
 0x285   :  { %4750 = vmatprep.mubr.msk.f32.mxu1 %vm5145_vm1, %v5144_v34 }
 0x340   :  { %v287_v42 = vpop.f32.mrf.mxu1 }
 0x341   :  { %v368_v44 = vmul.f32 0.35355338, %v287_v42  ;;  %v209_v42 = vld [vmem:[%s5907_s6] sm:$0xff] }
 0x342   :  { %v4742_v45 = vpop.f32.mrf.mxu1 }
 0x343   :  { %v382_v46 = vadd.f32 %v5330_v43, %v368_v44 }
 0x344   :  { %v364_v47 = vpop.f32.mrf.mxu1 }
 0x345   :  { %v369_v49 = vmul.f32 0.35355338, %v364_v47  ;;  %v384_v50 = vsel %vm216_vm2, %v382_v46, -inf }
 0x346   :  { %385 = vmax.xlane.f32.xlu1 %v384_v50  ;;  %v4747_v51 = vpop.f32.mrf.mxu1 }
 0x347   :  { %v383_v52 = vadd.f32 %v5336_v48, %v369_v49 }
 0x349   :  { %v387_v53 = vsel %vm216_vm2, %v383_v52, -inf }
 0x34a   :  { %388 = vmax.xlane.f32.xlu0 %v387_v53 }
 0x357   :  { %482 = vrot.lane.b32.xlu1 %v5307_v37, %s5147_s21 }
 0x35b   :  { %560 = vrot.lane.b32.xlu1 %v5309_v39, %s5148_s4 }
 0x35f   :  { %638 = vrot.lane.b32.xlu1 %v5307_v37, %s5148_s4 }
 0x3cf   :  { %v386_v54 = vpop.xlane.xlu1 %385 }
 0x3d0   :  { %v390_v55 = vsub.f32 %v382_v46, %v386_v54 }
 0x3d2   :  { %v392_v56 = vmul.f32 1.442695, %v390_v55  ;;  %v210_v55 = vld [vmem:[%s5907_s6 + $0x8] sm:$0xff] }
 0x3d3   :  { %v483_v57 = vpop.permute.xlu1 %482  ;;  %v389_v58 = vpop.xlane.xlu0 %388 }
 0x3d4   :  { %5048 = vpow2.f32 %v392_v56  ;;  %v391_v59 = vsub.f32 %v383_v52, %v389_v58 }
 0x3d6   :  { %v394_v60 = vmul.f32 1.442695, %v391_v59 }
 0x3d7   :  { %v561_v61 = vpop.permute.xlu1 %560 }
 0x3d8   :  { %5050 = vpow2.f32 %v394_v60  ;;  %4759 = vmatpush3.xpose.msk.msra.mxu0 %vm216_vm2, %v561_v61 }
 0x3d9   :  { %4768 = vmatprep.subr.mxu0 %v5144_v34 }
 0x3db   :  { %v639_v2 = vpop.permute.xlu1 %638 }
 0x3e1   :  { %v5049_v62 = vpop.eup %5048 }
 0x3e2   :  { %v396_v63 = vsel %vm216_vm2, %v5049_v62, 0.0 }
 0x3e3   :  { %397 = vadd.xlane.f32.xlu0 %v396_v63 }
 0x3e5   :  { %v5051_v0 = vpop.eup %5050 }
 0x3e6   :  { %v399_v1 = vsel %vm216_vm2, %v5051_v0, 0.0 }
 0x3e7   :  { %400 = vadd.xlane.f32.xlu1 %v399_v1 }
 0x3f8   :  { %636 = vrot.lane.b32.xlu1 %v5307_v37, %s5149_s22 }
 0x3f9   :  { %406 = vrot.lane.b32.xlu0 %v5309_v39, %s5147_s21 }
 0x3fd   :  { %558 = vrot.lane.b32.xlu0 %v5309_v39, %s5149_s22 }
 0x46c   :  { %v398_v3 = vpop.xlane.xlu0 %397 }
 0x46d   :  { %5052 = vrcp.f32 %v398_v3 }
 0x470   :  { %v401_v4 = vpop.xlane.xlu1 %400  ;;  %v407_v5 = vpop.permute.xlu0 %406 }
 0x471   :  { %5054 = vrcp.f32 %v401_v4  ;;  %4749 = vmatpush3.msra.mxu1 %v407_v5 }
 0x472   :  { %4753 = vmatprep.subr.mxu1 %v5144_v34 }
 0x474   :  { %v559_v6 = vpop.permute.xlu0 %558  ;;  %v637_v11 = vpop.permute.xlu1 %636 }
 0x475   :  { %4761 = vmatmul.mubr.msk.f32.vlgmr.msra.gmra.mxu0 %vm216_vm2, %v559_v6 }
 0x476   :  { %4770 = vmatprep.mubr.msk.f32.mxu0 %vm5145_vm1, %v5144_v34 }
 0x47a   :  { %v5053_v7 = vpop.eup %5052 }
 0x47b   :  { %v404_v8 = vmul.f32 %v5053_v7, %v5049_v62 }
 0x47d   :  { %4751 = vmatmul.mubr.msk.f32.vlgmr.msra.gmra.mxu1 %vm216_vm2, %v404_v8 }
 0x47e   :  { %v5055_v9 = vpop.eup %5054  ;;  %4754 = vmatpush3.msra.mxu1 %v483_v57  ;;  %4755 = vmatprep.mubr.msk.f32.mxu1 %vm5145_vm1, %v5144_v34 }
 0x47f   :  { %4763 = vmatprep.subr.mxu1 %v5144_v34  ;;  %v405_v10 = vmul.f32 %v5055_v9, %v5051_v0 }
 0x481   :  { %4756 = vmatmul.mubr.msk.f32.vlgmr.msra.gmra.mxu1 %vm216_vm2, %v405_v10 }
 0x482   :  { %4764 = vmatpush3.xpose.msk.msra.mxu1 %vm216_vm2, %v639_v2  ;;  %4765 = vmatprep.mubr.msk.f32.mxu1 %vm5145_vm1, %v5144_v34 }
 0x483   :  { %4773 = vmatprep.subr.mxu1 %v5144_v34 }
 0x485   :  { %4766 = vmatmul.mubr.msk.f32.vlgmr.msra.gmra.mxu1 %vm216_vm2, %v637_v11 }
 0x486   :  { %4775 = vmatprep.mubr.msk.f32.mxu1 %vm5145_vm1, %v5144_v34 }
 0x535   :  { %v632_v12 = vpop.f32.mrf.mxu0 }
 0x536   :  { %v714_v13 = vmul.f32 0.35355338, %v632_v12 }
 0x537   :  { %v4762_v14 = vpop.f32.mrf.mxu0 }
 0x538   :  { %v716_v15 = vadd.f32 %v5330_v43, %v714_v13 }
 0x53a   :  { %v718_v16 = vsel %vm216_vm2, %v716_v15, -inf }
 0x53b   :  { %719 = vmax.xlane.f32.xlu0 %v718_v16 }
 0x53d   :  { %v478_v17 = vpop.f32.mrf.mxu1 }
 0x53f   :  { %v4752_v18 = vpop.f32.mrf.mxu1 }
 0x541   :  { %v554_v19 = vpop.f32.mrf.mxu1 }
 0x543   :  { %v4757_v20 = vpop.f32.mrf.mxu1 }
 0x545   :  { %v710_v21 = vpop.f32.mrf.mxu1 }
 0x546   :  { %v715_v22 = vmul.f32 0.35355338, %v710_v21 }
 0x547   :  { %v4767_v23 = vpop.f32.mrf.mxu1 }
 0x548   :  { %v717_v24 = vadd.f32 %v5336_v48, %v715_v22 }
 0x54a   :  { %v721_v25 = vsel %vm216_vm2, %v717_v24, -inf }
 0x54b   :  { %722 = vmax.xlane.f32.xlu1 %v721_v25 }
 0x55c   :  { %816 = vrot.lane.b32.xlu1 %v5307_v37, %s5150_s23 }
 0x560   :  { %1056 = vrot.lane.b32.xlu1 %v5309_v39, %s5935_s24 }
 0x564   :  { %1134 = vrot.lane.b32.xlu1 %v5307_v37, %s5935_s24 }
 0x568   :  { %1132 = vrot.lane.b32.xlu1 %v5307_v37, %s5933_s2 }
 0x5c4   :  { %v720_v26 = vpop.xlane.xlu0 %719 }
 0x5c5   :  { %v724_v27 = vsub.f32 %v716_v15, %v720_v26 }
 0x5c7   :  { %v726_v28 = vmul.f32 1.442695, %v724_v27 }
 0x5c9   :  { %5056 = vpow2.f32 %v726_v28 }
 0x5d4   :  { %v723_v29 = vpop.xlane.xlu1 %722 }
 0x5d5   :  { %v725_v30 = vsub.f32 %v717_v24, %v723_v29 }
 0x5d6   :  { %v5057_v32 = vpop.eup %5056 }
 0x5d7   :  { %v728_v35 = vmul.f32 1.442695, %v725_v30  ;;  %v730_v36 = vsel %vm216_vm2, %v5057_v32, 0.0 }
 0x5d8   :  { %731 = vadd.xlane.f32.xlu0 %v730_v36  ;;  %v817_v38 = vpop.permute.xlu1 %816  ;;  %v211_v36 = vld [vmem:[%s5907_s6 + $0x10] sm:$0xff] }
 0x5d9   :  { %5058 = vpow2.f32 %v728_v35  ;;  %4774 = vmatpush3.msra.mxu1 %v817_v38 }
 0x5da   :  { %4783 = vmatprep.subr.mxu1 %v209_v42 }
 0x5dc   :  { %v1057_v50 = vpop.permute.xlu1 %1056 }
 0x5e0   :  { %v1135_v53 = vpop.permute.xlu1 %1134 }
 0x5e4   :  { %v1133_v54 = vpop.permute.xlu1 %1132 }
 0x5e6   :  { %v5059_v40 = vpop.eup %5058 }
 0x5e7   :  { %v733_v41 = vsel %vm216_vm2, %v5059_v40, 0.0 }
 0x5e8   :  { %734 = vadd.xlane.f32.xlu0 %v733_v41 }
 0x5fe   :  { %740 = vrot.lane.b32.xlu0 %v5309_v39, %s5150_s23 }
 0x602   :  { %1054 = vrot.lane.b32.xlu0 %v5309_v39, %s5933_s2 }
 0x661   :  { %v732_v44 = vpop.xlane.xlu0 %731 }
 0x662   :  { %5060 = vrcp.f32 %v732_v44 }
 0x66f   :  { %v5061_v46 = vpop.eup %5060 }
 0x670   :  { %v738_v49 = vmul.f32 %v5061_v46, %v5057_v32 }
 0x671   :  { %v735_v45 = vpop.xlane.xlu0 %734 }
 0x672   :  { %5062 = vrcp.f32 %v735_v45 }
 0x675   :  { %v741_v47 = vpop.permute.xlu0 %740 }
 0x676   :  { %4769 = vmatpush3.msra.mxu0 %v741_v47 }
 0x677   :  { %4771 = vmatmul.mubr.msk.f32.vlgmr.msra.gmra.mxu0 %vm216_vm2, %v738_v49  ;;  %4778 = vmatprep.subr.mxu0 %v210_v55 }
 0x678   :  { %4779 = vmatpush3.msra.mxu0 %v210_v55 }
 0x679   :  { %4788 = vmatprep.subr.mxu0 %v5144_v34  ;;  %v1055_v60 = vpop.permute.xlu0 %1054 }
 0x67f   :  { %v5063_v51 = vpop.eup %5062 }
 0x680   :  { %v739_v52 = vmul.f32 %v5063_v51, %v5059_v40 }
 0x682   :  { %4776 = vmatmul.mubr.msk.f32.vlgmr.msra.gmra.mxu1 %vm216_vm2, %v739_v52 }
 0x683   :  { %4785 = vmatprep.mubr.msk.f32.mxu1 %vm216_vm2, %v478_v17  ;;  %4784 = vmatpush3.msra.mxu1 %v209_v42 }
 0x684   :  { %4793 = vmatprep.subr.mxu1 %v5144_v34 }
 0x686   :  { %4786 = vmatmul.mubr.msk.f32.vlgmr.msra.gmra.mxu1 %vm216_vm2, %v554_v19 }
 0x687   :  { %4794 = vmatpush3.xpose.msk.msra.mxu1 %vm216_vm2, %v1135_v53  ;;  %4795 = vmatprep.mubr.msk.f32.mxu1 %vm5145_vm1, %v5144_v34 }
 0x688   :  { %4803 = vmatprep.subr.mxu1 %v5144_v34 }
 0x68a   :  { %4796 = vmatmul.mubr.msk.f32.vlgmr.msra.gmra.mxu1 %vm216_vm2, %v1133_v54 }
 0x68b   :  { %4805 = vmatprep.mubr.msk.f32.mxu1 %vm5145_vm1, %v5144_v34 }
 0x737   :  { %v812_v56 = vpop.f32.mrf.mxu0 }
 0x738   :  { %4780 = vmatprep.mubr.msk.f32.mxu0 %vm216_vm2, %v812_v56 }
 0x739   :  { %v4772_v57 = vpop.f32.mrf.mxu0 }
 0x742   :  { %v888_v58 = vpop.f32.mrf.mxu1 }
 0x743   :  { %4781 = vmatmul.mubr.msk.f32.vlgmr.msra.gmra.mxu0 %vm216_vm2, %v888_v58 }
 0x744   :  { %4789 = vmatpush3.xpose.msk.msra.mxu0 %vm216_vm2, %v1057_v50  ;;  %v4777_v59 = vpop.f32.mrf.mxu1  ;;  %4790 = vmatprep.mubr.msk.f32.mxu0 %vm5145_vm1, %v5144_v34 }
 0x745   :  { %4798 = vmatprep.subr.mxu0 %v5144_v34 }
 0x746   :  { %v5416_v61 = vpop.f32.mrf.mxu1 }
 0x747   :  { %4791 = vmatmul.mubr.msk.f32.vlgmr.msra.gmra.mxu0 %vm216_vm2, %v1055_v60 }
 0x748   :  { %v5419_v62 = vpop.f32.mrf.mxu1  ;;  %4800 = vmatprep.mubr.msk.f32.mxu0 %vm5145_vm1, %v5144_v34 }
 0x74a   :  { %v1206_v63 = vpop.f32.mrf.mxu1 }
 0x74b   :  { %v1211_v0 = vmul.f32 0.35355338, %v1206_v63 }
 0x74c   :  { %v4797_v1 = vpop.f32.mrf.mxu1 }
 0x74d   :  { %v1213_v2 = vadd.f32 %v5336_v48, %v1211_v0 }
 0x74f   :  { %v1217_v3 = vsel %vm216_vm2, %v1213_v2, -inf }
 0x750   :  { %1218 = vmax.xlane.f32.xlu1 %v1217_v3 }
 0x761   :  { %1312 = vrot.lane.b32.xlu1 %v5307_v37, %s5931_s30 }
 0x765   :  { %1473 = vrot.lane.b32.xlu1 %v5309_v39, %s5929_s0 }
 0x769   :  { %1551 = vrot.lane.b32.xlu1 %v5307_v37, %s5929_s0  ;;  %s5950_s0 = smov 72  }
 0x76d   :  { %1549 = vrot.lane.b32.xlu1 %v5307_v37, %s5927_s25 }
 0x7d9   :  { %v1219_v4 = vpop.xlane.xlu1 %1218 }
 0x7da   :  { %v1221_v6 = vsub.f32 %v1213_v2, %v1219_v4 }
 0x7dc   :  { %v1224_v7 = vmul.f32 1.442695, %v1221_v6 }
 0x7dd   :  { %v1313_v5 = vpop.permute.xlu1 %1312 }
 0x7de   :  { %4804 = vmatpush3.msra.mxu1 %v1313_v5  ;;  %5064 = vpow2.f32 %v1224_v7 }
 0x7df   :  { %4813 = vmatprep.subr.mxu1 %v5144_v34 }
 0x7e1   :  { %v1474_v25 = vpop.permute.xlu1 %1473 }
 0x7e5   :  { %v1552_v45 = vpop.permute.xlu1 %1551 }
 0x7e9   :  { %v1550_v49 = vpop.permute.xlu1 %1549 }
 0x7eb   :  { %v5065_v15 = vpop.eup %5064 }
 0x7ec   :  { %v1229_v16 = vsel %vm216_vm2, %v5065_v15, 0.0 }
 0x803   :  { %v5434_v8 = vpop.f32.mrf.mxu0 }
 0x804   :  { %v1051_v55 = vadd.f32 %v5416_v61, %v5434_v8 }
 0x805   :  { %v5436_v9 = vpop.f32.mrf.mxu0 }
 0x806   :  { %v1046_v57 = vadd.f32 %v5419_v62, %v5436_v9 }
 0x807   :  { %v1128_v10 = vpop.f32.mrf.mxu0 }
 0x808   :  { %v1210_v11 = vmul.f32 0.35355338, %v1128_v10 }
 0x809   :  { %v4792_v12 = vpop.f32.mrf.mxu0 }
 0x80a   :  { %v1212_v13 = vadd.f32 %v5330_v43, %v1210_v11 }
 0x80c   :  { %v1214_v14 = vsel %vm216_vm2, %v1212_v13, -inf }
 0x80d   :  { %1215 = vmax.xlane.f32.xlu0 %v1214_v14  ;;  %v212_v14 = vld [vmem:[%s5907_s6 + $0x18] sm:$0xff] }
 0x811   :  { %1230 = vadd.xlane.f32.xlu0 %v1229_v16 }
 0x896   :  { %v1216_v17 = vpop.xlane.xlu0 %1215 }
 0x897   :  { %v1220_v18 = vsub.f32 %v1212_v13, %v1216_v17 }
 0x899   :  { %v1222_v19 = vmul.f32 1.442695, %v1220_v18 }
 0x89a   :  { %v1231_v20 = vpop.xlane.xlu0 %1230 }
 0x89b   :  { %5066 = vpow2.f32 %v1222_v19  ;;  %v4496_v19 = vld [vmem:[%s5908_s7] ss:$0 sm:$0xff] }
 0x89c   :  { %5068 = vrcp.f32 %v1231_v20 }
 0x8a8   :  { %v5067_v21 = vpop.eup %5066 }
 0x8a9   :  { %v5069_v22 = vpop.eup %5068  ;;  %v1226_v23 = vsel %vm216_vm2, %v5067_v21, 0.0 }
 0x8aa   :  { %1227 = vadd.xlane.f32.xlu0 %v1226_v23  ;;  %v1235_v24 = vmul.f32 %v5069_v22, %v5065_v15 }
 0x8ac   :  { %4806 = vmatmul.mubr.msk.f32.vlgmr.msra.gmra.mxu1 %vm216_vm2, %v1235_v24 }
 0x8ad   :  { %4814 = vmatpush3.xpose.msk.msra.mxu1 %vm216_vm2, %v1474_v25  ;;  %4815 = vmatprep.mubr.msk.f32.mxu1 %vm5145_vm1, %v5144_v34 }
 0x8ae   :  { %4823 = vmatprep.subr.mxu1 %v5144_v34 }
 0x8c0   :  { %1236 = vrot.lane.b32.xlu0 %v5309_v39, %s5931_s30  ;;  %s5949_s30 = smov 48  }
 0x8c4   :  { %1471 = vrot.lane.b32.xlu0 %v5309_v39, %s5927_s25  ;;  %s5952_s25 = smov 40  }
 0x933   :  { %v1228_v26 = vpop.xlane.xlu0 %1227 }
 0x934   :  { %5070 = vrcp.f32 %v1228_v26 }
 0x937   :  { %v1237_v27 = vpop.permute.xlu0 %1236 }
 0x938   :  { %4799 = vmatpush3.msra.mxu0 %v1237_v27 }
 0x939   :  { %4808 = vmatprep.subr.mxu0 %v211_v36 }
 0x93b   :  { %v1472_v28 = vpop.permute.xlu0 %1471 }
 0x93c   :  { %4816 = vmatmul.mubr.msk.f32.vlgmr.msra.gmra.mxu1 %vm216_vm2, %v1472_v28 }
 0x93d   :  { %4825 = vmatprep.mubr.msk.f32.mxu1 %vm5145_vm1, %v5144_v34 }
 0x941   :  { %v5071_v29 = vpop.eup %5070 }
 0x942   :  { %v1234_v30 = vmul.f32 %v5071_v29, %v5067_v21 }
 0x944   :  { %4801 = vmatmul.mubr.msk.f32.vlgmr.msra.gmra.mxu0 %vm216_vm2, %v1234_v30 }
 0x945   :  { %4809 = vmatpush3.msra.mxu0 %v211_v36 }
 0x946   :  { %4818 = vmatprep.subr.mxu0 %v5144_v34 }
 0x96c   :  { %v1384_v32 = vpop.f32.mrf.mxu1 }
 0x96e   :  { %v4807_v35 = vpop.f32.mrf.mxu1 }
 0x9fc   :  { %v1545_v38 = vpop.f32.mrf.mxu1 }
 0x9fd   :  { %v1627_v40 = vmul.f32 0.35355338, %v1545_v38 }
 0x9fe   :  { %v4817_v41 = vpop.f32.mrf.mxu1 }
 0x9ff   :  { %v1629_v42 = vadd.f32 %v5330_v43, %v1627_v40 }
 0xa01   :  { %v1631_v44 = vsel %vm216_vm2, %v1629_v42, -inf }
 0xa02   :  { %1632 = vmax.xlane.f32.xlu0 %v1631_v44  ;;  %v1945_v44 = vld [vmem:[%s5909_s10 + $0x10] sm:$0xff] }
 0xa04   :  { %v1308_v46 = vpop.f32.mrf.mxu0 }
 0xa05   :  { %4810 = vmatprep.mubr.msk.f32.mxu0 %vm216_vm2, %v1308_v46  ;;  %v1943_v46 = vld [vmem:[%s5909_s10] sm:$0xff] }
 0xa06   :  { %v4802_v47 = vpop.f32.mrf.mxu0  ;;  %4811 = vmatmul.mubr.msk.f32.vlgmr.msra.gmra.mxu0 %vm216_vm2, %v1384_v32 }
 0xa07   :  { %4819 = vmatpush3.xpose.msk.msra.mxu0 %vm216_vm2, %v1552_v45  ;;  %4820 = vmatprep.mubr.msk.f32.mxu0 %vm5145_vm1, %v5144_v34  ;;  %v1944_v45 = vld [vmem:[%s5909_s10 + $0x8] sm:$0xff] }
 0xa08   :  { %4828 = vmatprep.subr.mxu0 %v5144_v34 }
 0xa0a   :  { %4821 = vmatmul.mubr.msk.f32.vlgmr.msra.gmra.mxu0 %vm216_vm2, %v1550_v49 }
 0xa0b   :  { %4830 = vmatprep.mubr.msk.f32.mxu0 %vm5145_vm1, %v5144_v34 }
 0xa8b   :  { %v1633_v50 = vpop.xlane.xlu0 %1632 }
 0xa8c   :  { %v1637_v51 = vsub.f32 %v1629_v42, %v1633_v50 }
 0xa8e   :  { %v1639_v52 = vmul.f32 1.442695, %v1637_v51 }
 0xa90   :  { %5072 = vpow2.f32 %v1639_v52 }
 0xa9d   :  { %v5073_v53 = vpop.eup %5072 }
 0xa9e   :  { %v1643_v54 = vsel %vm216_vm2, %v5073_v53, 0.0 }
 0xa9f   :  { %1644 = vadd.xlane.f32.xlu0 %v1643_v54 }
 0xac6   :  { %v4812_v56 = vpop.f32.mrf.mxu0 }
 0xac7   :  { %v1470_v58 = vadd.f32 %v4812_v56, %v1051_v55  ;;  %v4497_v55 = vld [vmem:[%s5910_s8] ss:$0 sm:$0xff] }
 0xac8   :  { %v1460_v59 = vpop.f32.mrf.mxu0 }
 0xac9   :  { %v1469_v60 = vadd.f32 %v1460_v59, %v1046_v57 }
 0xaca   :  { %v1623_v63 = vpop.f32.mrf.mxu0 }
 0xacb   :  { %v1628_v0 = vmul.f32 0.35355338, %v1623_v63 }
 0xacc   :  { %v4822_v1 = vpop.f32.mrf.mxu0 }
 0xacd   :  { %v1630_v2 = vadd.f32 %v5336_v48, %v1628_v0 }
 0xacf   :  { %v1634_v3 = vsel %vm216_vm2, %v1630_v2, -inf }
 0xad0   :  { %1635 = vmax.xlane.f32.xlu1 %v1634_v3  ;;  %v2059_v3 = vld [vmem:[%s5912_s12 + $0x30] sm:$0xff] }
 0xae1   :  { %1729 = vrot.lane.b32.xlu1 %v5307_v37, %s5925_s29 }
 0xb28   :  { %v1645_v8 = vpop.xlane.xlu0 %1644 }
 0xb59   :  { %v1636_v61 = vpop.xlane.xlu1 %1635 }
 0xb5a   :  { %v1638_v4 = vsub.f32 %v1630_v2, %v1636_v61  ;;  %v2060_v2 = vld [vmem:[%s5912_s12 + $0x38] sm:$0xff]  ;;  %v2058_v61 = vld [vmem:[%s5912_s12 + $0x28] sm:$0xff] }
 0xb5c   :  { %v1641_v5 = vmul.f32 1.442695, %v1638_v4  ;;  %v2057_v4 = vld [vmem:[%s5912_s12 + $0x20] sm:$0xff] }
 0xb5d   :  { %v1730_v6 = vpop.permute.xlu1 %1729 }
 0xb5e   :  { %5074 = vpow2.f32 %v1641_v5  ;;  %4829 = vmatpush3.msra.mxu0 %v1730_v6  ;;  %v2056_v5 = vld [vmem:[%s5912_s12 + $0x18] sm:$0xff]  ;;  %v2055_v6 = vld [vmem:[%s5912_s12 + $0x10] sm:$0xff] }
 0xb5f   :  { %5076 = vrcp.f32 %v1645_v8  ;;  %v4499_v8 = vld [vmem:[%s5913_s11] ss:$0 sm:$0xff] }
 0xb6b   :  { %v5075_v62 = vpop.eup %5074 }
 0xb6c   :  { %v1646_v7 = vsel %vm216_vm2, %v5075_v62, 0.0  ;;  %v5077_v10 = vpop.eup %5076 }
 0xb6d   :  { %1647 = vadd.xlane.f32.xlu0 %v1646_v7  ;;  %v1651_v37 = vmul.f32 %v5077_v10, %v5073_v53  ;;  %v2053_v7 = vld [vmem:[%s5912_s12] sm:$0xff] }
 0xb83   :  { %1653 = vrot.lane.b32.xlu0 %v5309_v39, %s5925_s29  ;;  %s5948_s29 = smov 112  }
 0xbf6   :  { %v1648_v9 = vpop.xlane.xlu0 %1647 }
 0xbf7   :  { %5078 = vrcp.f32 %v1648_v9 }
 0xbfa   :  { %v1654_v11 = vpop.permute.xlu0 %1653 }
 0xbfb   :  { %4824 = vmatpush3.msra.mxu1 %v1654_v11 }
 0xbfc   :  { %4826 = vmatmul.mubr.msk.f32.vlgmr.msra.gmra.mxu1 %vm216_vm2, %v1651_v37  ;;  %4833 = vmatprep.subr.mxu1 %v212_v14 }
 0xbfd   :  { %4834 = vmatpush3.msra.mxu1 %v212_v14 }
 0xbfe   :  { %4849 = vmatprep.subr.mxu1 %v2060_v2 }
 0xc04   :  { %v5079_v12 = vpop.eup %5078 }
 0xc05   :  { %v1652_v13 = vmul.f32 %v5079_v12, %v5075_v62  ;;  %v2054_v62 = vld [vmem:[%s5912_s12 + $0x8] sm:$0xff] }
 0xc07   :  { %4831 = vmatmul.mubr.msk.f32.vlgmr.msra.gmra.mxu0 %vm216_vm2, %v1652_v13 }
 0xcbc   :  { %v1725_v39 = vpop.f32.mrf.mxu1 }
 0xcbd   :  { %4835 = vmatprep.mubr.msk.f32.mxu1 %vm216_vm2, %v1725_v39 }
 0xcbe   :  { %v4827_v15 = vpop.f32.mrf.mxu1 }
 0xcc7   :  { %v1801_v16 = vpop.f32.mrf.mxu0 }
 0xcc8   :  { %4836 = vmatmul.mubr.msk.f32.vlgmr.msra.gmra.mxu1 %vm216_vm2, %v1801_v16 }
 0xcc9   :  { %v4832_v17 = vpop.f32.mrf.mxu0  ;;  %4850 = vmatpush3.msra.mxu1 %v2060_v2  ;;  %v4505_v2 = vld [vmem:[%s5915_s14] ss:$0 sm:$0xff] }
 0xcca   :  { %4851 = vmatprep.subr.mxu1 %v2059_v3 }
 0xccb   :  { %4852 = vmatpush3.msra.mxu1 %v2059_v3 }
 0xccc   :  { %4853 = vmatprep.subr.mxu1 %v2058_v61 }
 0xccd   :  { %4854 = vmatpush3.msra.mxu1 %v2058_v61 }
 0xcce   :  { %4855 = vmatprep.subr.mxu1 %v2057_v4 }
 0xccf   :  { %4856 = vmatpush3.msra.mxu1 %v2057_v4 }
 0xcd0   :  { %4857 = vmatprep.subr.mxu1 %v2056_v5 }
 0xcd1   :  { %4858 = vmatpush3.msra.mxu1 %v2056_v5 }
 0xcd2   :  { %4859 = vmatprep.subr.mxu1 %v2055_v6 }
 0xcd3   :  { %4860 = vmatpush3.msra.mxu1 %v2055_v6  ;;  %v4506_v6 = vld [vmem:[%s5916_s15] ss:$0 sm:$0xff] }
 0xcd4   :  { %4861 = vmatprep.subr.mxu1 %v2054_v62 }
 0xcd5   :  { %4862 = vmatpush3.msra.mxu1 %v2054_v62 }
 0xcd6   :  { %4863 = vmatprep.subr.mxu1 %v2053_v7 }
 0xcd7   :  { %4864 = vmatpush3.msra.mxu1 %v2053_v7 }
 0xcd8   :  { %4884 = vmatprep.subr.mxu1 %v5144_v34 }
 0xd88   :  { %v4837_v18 = vpop.f32.mrf.mxu1 }
 0xd89   :  { %v1887_v20 = vadd.f32 %v4837_v18, %v1470_v58 }
 0xd8a   :  { %v1877_v21 = vpop.f32.mrf.mxu1 }
 0xd8b   :  { %v1896_v22 = vadd.f32 %v4496_v19, %v1887_v20  ;;  %v1886_v23 = vadd.f32 %v1877_v21, %v1469_v60  ;;  %v4498_v60 = vld [vmem:[%s5911_s9] ss:$0 sm:$0xff] }
 0xd8d   :  { %v1895_v24 = vadd.f32 %v4496_v19, %v1886_v23  ;;  %v1898_v25 = vadd.f32 %v1896_v22, %v5294_v33 }
 0xd8f   :  { %v1904_v26 = vsel %vm71_vm0, %v1898_v25, 0.0  ;;  %v1897_v27 = vadd.f32 %v1895_v24, %v5290_v31  ;;  %v1946_v31 = vld [vmem:[%s5909_s10 + $0x18] sm:$0xff] }
 0xd90   :  { %1905 = vadd.xlane.f32.xlu0 %v1904_v26  ;;  %4838 = vmatprep.subr.mxu0 %v1946_v31 }
 0xd91   :  { %v1901_v28 = vsel %vm71_vm0, %v1897_v27, 0.0  ;;  %4839 = vmatpush3.msra.mxu0 %v1946_v31 }
 0xd92   :  { %1902 = vadd.xlane.f32.xlu1 %v1901_v28  ;;  %4840 = vmatprep.subr.mxu0 %v1945_v44 }
 0xd93   :  { %4841 = vmatpush3.msra.mxu0 %v1945_v44 }
 0xd94   :  { %4842 = vmatprep.subr.mxu0 %v1944_v45 }
 0xd95   :  { %4843 = vmatpush3.msra.mxu0 %v1944_v45 }
 0xd96   :  { %4844 = vmatprep.subr.mxu0 %v1943_v46 }
 0xd97   :  { %4845 = vmatpush3.msra.mxu0 %v1943_v46 }
 0xe19   :  { %v1906_v29 = vpop.xlane.xlu0 %1905 }
 0xe1a   :  { %v1908_v30 = vmul.f32 0.03125, %v1906_v29  ;;  %v4502_v29 = vld [vmem:[%s5914_s13] ss:$0 sm:$0xff] }
 0xe1b   :  { %v1903_v32 = vpop.xlane.xlu1 %1902 }
 0xe1c   :  { %v1910_v35 = vsub.f32 %v1898_v25, %v1908_v30  ;;  %v1907_v36 = vmul.f32 0.03125, %v1903_v32 }
 0xe1e   :  { %v1909_v38 = vsub.f32 %v1897_v27, %v1907_v36  ;;  %v1912_v40 = vmul.f32 %v1910_v35, %v1910_v35 }
 0xe20   :  { %v1916_v41 = vsel %vm71_vm0, %v1912_v40, 0.0  ;;  %v1911_v42 = vmul.f32 %v1909_v38, %v1909_v38 }
 0xe21   :  { %1917 = vadd.xlane.f32.xlu1 %v1916_v41 }
 0xe22   :  { %v1913_v33 = vsel %vm71_vm0, %v1911_v42, 0.0 }
 0xe23   :  { %1914 = vadd.xlane.f32.xlu0 %v1913_v33 }
 0xeaa   :  { %v1918_v47 = vpop.xlane.xlu1 %1917 }
 0xeab   :  { %v1920_v49 = vmul.f32 0.03125, %v1918_v47 }
 0xeac   :  { %v1915_v50 = vpop.xlane.xlu0 %1914 }
 0xead   :  { %v1922_v51 = vadd.f32 1e-12, %v1920_v49  ;;  %v1919_v52 = vmul.f32 0.03125, %v1915_v50 }
 0xeaf   :  { %5080 = vrsqrt.f32 %v1922_v51  ;;  %v1921_v53 = vadd.f32 1e-12, %v1919_v52 }
 0xeb1   :  { %5082 = vrsqrt.f32 %v1921_v53  ;;  %v4510_v53 = vld [vmem:[%s5943_s26 + $0x38] sm:$0xff] }
 0xeb2   :  { %4868 = vmatprep.subr.mxu0 %v4510_v53 }
 0xebc   :  { %v5081_v54 = vpop.eup %5080 }
 0xebd   :  { %v1926_v56 = vmul.f32 %v5081_v54, %v1910_v35  ;;  %v4509_v54 = vld [vmem:[%s5943_s26 + $0x30] sm:$0xff] }
 0xebe   :  { %v5083_v57 = vpop.eup %5082 }
 0xebf   :  { %v1925_v58 = vmul.f32 %v5083_v57, %v1909_v38  ;;  %v1934_v59 = vmul.f32 %v4497_v55, %v1926_v56  ;;  %v4507_v56 = vld [vmem:[%s5943_s26 + $0x20] sm:$0xff] }
 0xec1   :  { %v1933_v63 = vmul.f32 %v4497_v55, %v1925_v58  ;;  %v5518_v1 = vadd.f32 %v4498_v60, %v1934_v59  ;;  %v4508_v55 = vld [vmem:[%s5943_s26 + $0x28] sm:$0xff]  ;;  %s5951_s26 = smov 104  }
 0xec3   :  { %v5516_v0 = vadd.f32 %v4498_v60, %v1933_v63 }
 0xec5   :  { %4846 = vmatprep.mubr.msk.f32.mxu0 %vm71_vm0, %v5516_v0 }
 0xec6   :  { %4847 = vmatmul.mubr.msk.f32.vlgmr.msra.gmra.mxu0 %vm71_vm0, %v5518_v1 }
 0xec7   :  { %4869 = vmatpush3.msra.mxu0 %v4510_v53 }
 0xec8   :  { %4870 = vmatprep.subr.mxu0 %v4509_v54 }
 0xec9   :  { %4871 = vmatpush3.msra.mxu0 %v4509_v54 }
 0xeca   :  { %4872 = vmatprep.subr.mxu0 %v4508_v55 }
 0xecb   :  { %4873 = vmatpush3.msra.mxu0 %v4508_v55 }
 0xecc   :  { %4874 = vmatprep.subr.mxu0 %v4507_v56 }
 0xecd   :  { %4875 = vmatpush3.msra.mxu0 %v4507_v56 }
 0xece   :  { %4879 = vmatprep.subr.mxu0 %v5144_v34 }
 0xf86   :  { %v4848_v9 = vpop.f32.mrf.mxu0 }
 0xf87   :  { %v2032_v10 = vadd.f32 %v4848_v9, %v4499_v8  ;;  %v4512_v9 = vld [vmem:[%s5946_s27 + $0x1] ss:$0 sm:$0xff] }
 0xf88   :  { %v2026_v11 = vpop.f32.mrf.mxu0 }
 0xf89   :  { %v2038_v37 = vmul.f32 0.044715, %v2032_v10  ;;  %v2027_v12 = vadd.f32 %v4499_v8, %v2026_v11  ;;  %v2036_v26 = vmul.f32 0.5, %v2032_v10 }
 0xf8b   :  { %v2040_v13 = vmul.f32 %v2038_v37, %v2032_v10  ;;  %v2037_v14 = vmul.f32 0.044715, %v2027_v12  ;;  %v2035_v24 = vmul.f32 0.5, %v2027_v12 }
 0xf8d   :  { %v2042_v39 = vmul.f32 %v2040_v13, %v2032_v10  ;;  %v2039_v15 = vmul.f32 %v2037_v14, %v2027_v12 }
 0xf8f   :  { %v2044_v16 = vadd.f32 %v2042_v39, %v2032_v10  ;;  %v2041_v17 = vmul.f32 %v2039_v15, %v2027_v12 }
 0xf91   :  { %v2046_v18 = vmul.f32 0.7978846, %v2044_v16  ;;  %v2043_v19 = vadd.f32 %v2041_v17, %v2027_v12 }
 0xf93   :  { %5084 = vtanh.f32 %v2046_v18  ;;  %v2045_v20 = vmul.f32 0.7978846, %v2043_v19 }
 0xf95   :  { %5086 = vtanh.f32 %v2045_v20 }
 0xfa0   :  { %v5085_v21 = vpop.eup %5084 }
 0xfa1   :  { %v2050_v23 = vadd.f32 1.0, %v5085_v21 }
 0xfa2   :  { %v5087_v22 = vpop.eup %5086 }
 0xfa3   :  { %v2049_v25 = vadd.f32 1.0, %v5087_v22  ;;  %v2052_v28 = vmul.f32 %v2050_v23, %v2036_v26 }
 0xfa5   :  { %v2051_v27 = vmul.f32 %v2049_v25, %v2035_v24 }
 0xfa7   :  { %4865 = vmatprep.mubr.msk.f32.mxu1 %vm2068_vm3, %v2051_v27 }
 0xfa8   :  { %4866 = vmatmul.mubr.msk.f32.vlgmr.msra.gmra.mxu1 %vm2068_vm3, %v2052_v28 }
 0xfa9   :  { %4886 = vmatprep.mubr.msk.f32.mxu1 %vm5145_vm1, %v5144_v34 }
0x1068   :  { %v4867_v30 = vpop.f32.mrf.mxu1 }
0x1069   :  { %v2147_v32 = vadd.f32 %v4867_v30, %v4502_v29 }
0x106a   :  { %v2141_v35 = vpop.f32.mrf.mxu1 }
0x106b   :  { %v2142_v36 = vadd.f32 %v4502_v29, %v2141_v35  ;;  %v2151_v38 = vadd.f32 %v2147_v32, %v5518_v1 }
0x106d   :  { %v2157_v40 = vsel %vm71_vm0, %v2151_v38, 0.0  ;;  %v2150_v41 = vadd.f32 %v2142_v36, %v5516_v0 }
0x106e   :  { %2158 = vadd.xlane.f32.xlu1 %v2157_v40 }
0x106f   :  { %v2154_v42 = vsel %vm71_vm0, %v2150_v41, 0.0 }
0x1070   :  { %2155 = vadd.xlane.f32.xlu0 %v2154_v42 }
0x10f7   :  { %v2159_v33 = vpop.xlane.xlu1 %2158 }
0x10f8   :  { %v2161_v31 = vmul.f32 0.03125, %v2159_v33 }
0x10f9   :  { %v2156_v44 = vpop.xlane.xlu0 %2155 }
0x10fa   :  { %v2163_v45 = vsub.f32 %v2151_v38, %v2161_v31  ;;  %v2160_v46 = vmul.f32 0.03125, %v2156_v44 }
0x10fc   :  { %v2162_v47 = vsub.f32 %v2150_v41, %v2160_v46  ;;  %v2165_v49 = vmul.f32 %v2163_v45, %v2163_v45 }
0x10fe   :  { %v2169_v50 = vsel %vm71_vm0, %v2165_v49, 0.0  ;;  %v2164_v51 = vmul.f32 %v2162_v47, %v2162_v47 }
0x10ff   :  { %2170 = vadd.xlane.f32.xlu1 %v2169_v50 }
0x1100   :  { %v2166_v52 = vsel %vm71_vm0, %v2164_v51, 0.0 }
0x1101   :  { %2167 = vadd.xlane.f32.xlu0 %v2166_v52 }
0x1188   :  { %v2171_v57 = vpop.xlane.xlu1 %2170 }
0x1189   :  { %v2173_v58 = vmul.f32 0.03125, %v2171_v57 }
0x118a   :  { %v2168_v59 = vpop.xlane.xlu0 %2167 }
0x118b   :  { %v2175_v60 = vadd.f32 1e-12, %v2173_v58  ;;  %v2172_v63 = vmul.f32 0.03125, %v2168_v59  ;;  %v5656_v58 = vld [vmem:[%s5906_s1 + $0x1] ss:$0 sm:$0xff] }
0x118d   :  { %5088 = vrsqrt.f32 %v2175_v60  ;;  %v2174_v0 = vadd.f32 1e-12, %v2172_v63 }
0x118f   :  { %5090 = vrsqrt.f32 %v2174_v0  ;;  %v5663_v0 = vld [vmem:[%s5906_s1] ss:$0 sm:$0xff] }
0x119a   :  { %v5089_v1 = vpop.eup %5088 }
0x119b   :  { %v2179_v3 = vmul.f32 %v5089_v1, %v2163_v45 }
0x119c   :  { %v5091_v61 = vpop.eup %5090 }
0x119d   :  { %v2178_v4 = vmul.f32 %v5091_v61, %v2162_v47  ;;  %v2187_v5 = vmul.f32 %v4505_v2, %v2179_v3 }
0x119f   :  { %v2186_v62 = vmul.f32 %v4505_v2, %v2178_v4  ;;  %v5586_v8 = vadd.f32 %v4506_v6, %v2187_v5 }
0x11a1   :  { %v5584_v7 = vadd.f32 %v4506_v6, %v2186_v62 }
0x11a3   :  { %4876 = vmatprep.mubr.msk.f32.mxu0 %vm71_vm0, %v5584_v7 }
0x11a4   :  { %4877 = vmatmul.mubr.msk.f32.vlgmr.msra.gmra.mxu0 %vm71_vm0, %v5586_v8 }
0x11a5   :  { %4881 = vmatprep.mubr.msk.f32.mxu0 %vm5145_vm1, %v5144_v34 }
0x1264   :  { %v4878_v10 = vpop.f32.mrf.mxu0 }
0x1265   :  { %v5597_v11 = vadd.f32 %v4878_v10, %v4512_v9 }
0x1266   :  { %v2281_v37 = vpop.f32.mrf.mxu0 }
0x1267   :  { %v5599_v12 = vadd.f32 %v4512_v9, %v2281_v37  ;;  %2373 = vrot.lane.b32.xlu1 %v5597_v11, %s5146_s28 }
0x1269   :  { %2296 = vrot.lane.b32.xlu0 %v5599_v12, %s5146_s28 }
0x12d9   :  { %v2374_v13 = vpop.permute.xlu1 %2373 }
0x12da   :  { %4885 = vmatpush3.xpose.msk.msra.mxu1 %vm216_vm2, %v2374_v13 }
0x12db   :  { %v2297_v14 = vpop.permute.xlu0 %2296  ;;  %4894 = vmatprep.subr.mxu1 %v5144_v34 }
0x12dc   :  { %4880 = vmatpush3.xpose.msk.msra.mxu0 %vm216_vm2, %v2297_v14 }
0x12dd   :  { %4887 = vmatmul.mubr.msk.f32.vlgmr.msra.gmra.mxu1 %vm216_vm2, %v5597_v11  ;;  %4889 = vmatprep.subr.mxu0 %v5144_v34 }
0x12de   :  { %4896 = vmatprep.mubr.msk.f32.mxu1 %vm5145_vm1, %v5144_v34 }
0x12df   :  { %4882 = vmatmul.mubr.msk.f32.vlgmr.msra.gmra.mxu0 %vm216_vm2, %v5599_v12 }
0x12e0   :  { %4891 = vmatprep.mubr.msk.f32.mxu0 %vm5145_vm1, %v5144_v34 }
0x139d   :  { %v2445_v39 = vpop.f32.mrf.mxu1 }
0x139e   :  { %v2450_v15 = vmul.f32 0.35355338, %v2445_v39  ;;  %v4515_v39 = vld [vmem:[%s5907_s6 + $0x20] sm:$0xff] }
0x139f   :  { %v2368_v16 = vpop.f32.mrf.mxu0  ;;  %v4888_v17 = vpop.f32.mrf.mxu1 }
0x13a0   :  { %v2449_v18 = vmul.f32 0.35355338, %v2368_v16  ;;  %v2452_v19 = vadd.f32 %v5336_v48, %v2450_v15 }
0x13a1   :  { %v4883_v20 = vpop.f32.mrf.mxu0 }
0x13a2   :  { %v2456_v21 = vsel %vm216_vm2, %v2452_v19, -inf  ;;  %v2451_v22 = vadd.f32 %v5330_v43, %v2449_v18 }
0x13a3   :  { %2457 = vmax.xlane.f32.xlu0 %v2456_v21 }
0x13a4   :  { %v2453_v23 = vsel %vm216_vm2, %v2451_v22, -inf }
0x13a5   :  { %2454 = vmax.xlane.f32.xlu1 %v2453_v23 }
0x142c   :  { %v2458_v24 = vpop.xlane.xlu0 %2457 }
0x142d   :  { %v2460_v25 = vsub.f32 %v2452_v19, %v2458_v24 }
0x142e   :  { %v2455_v26 = vpop.xlane.xlu1 %2454 }
0x142f   :  { %v2463_v27 = vmul.f32 1.442695, %v2460_v25  ;;  %v2459_v28 = vsub.f32 %v2451_v22, %v2455_v26  ;;  %v4516_v25 = vld [vmem:[%s5907_s6 + $0x28] sm:$0xff] }
0x1431   :  { %5092 = vpow2.f32 %v2463_v27  ;;  %v2461_v29 = vmul.f32 1.442695, %v2459_v28 }
0x1433   :  { %5094 = vpow2.f32 %v2461_v29 }
0x143e   :  { %v5093_v30 = vpop.eup %5092 }
0x143f   :  { %v2468_v48 = vsel %vm216_vm2, %v5093_v30, 0.0 }
0x1440   :  { %v5095_v32 = vpop.eup %5094  ;;  %2469 = vadd.xlane.f32.xlu1 %v2468_v48 }
0x1441   :  { %v2465_v35 = vsel %vm216_vm2, %v5095_v32, 0.0 }
0x1442   :  { %2466 = vadd.xlane.f32.xlu0 %v2465_v35 }
0x1451   :  { %2551 = vrot.lane.b32.xlu1 %v5597_v11, %s5147_s21 }
0x1455   :  { %2629 = vrot.lane.b32.xlu1 %v5599_v12, %s5148_s4 }
0x1458   :  { %2475 = vrot.lane.b32.xlu0 %v5599_v12, %s5147_s21 }
0x1459   :  { %2707 = vrot.lane.b32.xlu1 %v5597_v11, %s5148_s4 }
0x145c   :  { %2627 = vrot.lane.b32.xlu0 %v5599_v12, %s5149_s22 }
0x145d   :  { %2705 = vrot.lane.b32.xlu1 %v5597_v11, %s5149_s22  ;;  %s5947_s22 = smov 80  }
0x14c9   :  { %v2470_v43 = vpop.xlane.xlu1 %2469 }
0x14ca   :  { %5096 = vrcp.f32 %v2470_v43 }
0x14cb   :  { %v2467_v36 = vpop.xlane.xlu0 %2466 }
0x14cc   :  { %5098 = vrcp.f32 %v2467_v36 }
0x14cd   :  { %v2552_v38 = vpop.permute.xlu1 %2551 }
0x14ce   :  { %4895 = vmatpush3.msra.mxu1 %v2552_v38 }
0x14cf   :  { %v2476_v40 = vpop.permute.xlu0 %2475  ;;  %4904 = vmatprep.subr.mxu1 %v5144_v34 }
0x14d0   :  { %4890 = vmatpush3.msra.mxu0 %v2476_v40 }
0x14d1   :  { %v2630_v41 = vpop.permute.xlu1 %2629  ;;  %4899 = vmatprep.subr.mxu0 %v5144_v34 }
0x14d3   :  { %v2628_v47 = vpop.permute.xlu0 %2627 }
0x14d5   :  { %v2708_v33 = vpop.permute.xlu1 %2707 }
0x14d7   :  { %v5097_v42 = vpop.eup %5096 }
0x14d8   :  { %v2474_v31 = vmul.f32 %v5097_v42, %v5093_v30 }
0x14d9   :  { %v5099_v44 = vpop.eup %5098  ;;  %v2706_v46 = vpop.permute.xlu1 %2705 }
0x14da   :  { %4897 = vmatmul.mubr.msk.f32.vlgmr.msra.gmra.mxu1 %vm216_vm2, %v2474_v31  ;;  %v2473_v45 = vmul.f32 %v5099_v44, %v5095_v32 }
0x14db   :  { %4905 = vmatpush3.xpose.msk.msra.mxu1 %vm216_vm2, %v2708_v33  ;;  %4906 = vmatprep.mubr.msk.f32.mxu1 %vm5145_vm1, %v5144_v34 }
0x14dc   :  { %4892 = vmatmul.mubr.msk.f32.vlgmr.msra.gmra.mxu0 %vm216_vm2, %v2473_v45  ;;  %4914 = vmatprep.subr.mxu1 %v5144_v34 }
0x14dd   :  { %4900 = vmatpush3.xpose.msk.msra.mxu0 %vm216_vm2, %v2630_v41  ;;  %4901 = vmatprep.mubr.msk.f32.mxu0 %vm5145_vm1, %v5144_v34 }
0x14de   :  { %4907 = vmatmul.mubr.msk.f32.vlgmr.msra.gmra.mxu1 %vm216_vm2, %v2706_v46  ;;  %4909 = vmatprep.subr.mxu0 %v5144_v34 }
0x14df   :  { %4916 = vmatprep.mubr.msk.f32.mxu1 %vm5145_vm1, %v5144_v34 }
0x14e0   :  { %4902 = vmatmul.mubr.msk.f32.vlgmr.msra.gmra.mxu0 %vm216_vm2, %v2628_v47 }
0x14e1   :  { %4911 = vmatprep.mubr.msk.f32.mxu0 %vm5145_vm1, %v5144_v34 }
0x159a   :  { %v2623_v49 = vpop.f32.mrf.mxu1 }
0x159c   :  { %v2547_v50 = vpop.f32.mrf.mxu0  ;;  %v4898_v51 = vpop.f32.mrf.mxu1 }
0x159e   :  { %v4893_v52 = vpop.f32.mrf.mxu0  ;;  %v2779_v53 = vpop.f32.mrf.mxu1 }
0x159f   :  { %v2784_v54 = vmul.f32 0.35355338, %v2779_v53 }
0x15a0   :  { %v2701_v55 = vpop.f32.mrf.mxu0  ;;  %v4908_v56 = vpop.f32.mrf.mxu1 }
0x15a1   :  { %v2783_v57 = vmul.f32 0.35355338, %v2701_v55  ;;  %v2786_v59 = vadd.f32 %v5656_v58, %v2784_v54 }
0x15a2   :  { %v4903_v60 = vpop.f32.mrf.mxu0 }
0x15a3   :  { %v2790_v63 = vsel %vm216_vm2, %v2786_v59, -inf  ;;  %v2785_v1 = vadd.f32 %v5663_v0, %v2783_v57 }
0x15a4   :  { %2791 = vmax.xlane.f32.xlu1 %v2790_v63 }
0x15a5   :  { %v2787_v2 = vsel %vm216_vm2, %v2785_v1, -inf }
0x15a6   :  { %2788 = vmax.xlane.f32.xlu0 %v2787_v2 }
0x15b5   :  { %2885 = vrot.lane.b32.xlu1 %v5597_v11, %s5150_s23 }
0x15b9   :  { %3125 = vrot.lane.b32.xlu1 %v5599_v12, %s5947_s22 }
0x15bd   :  { %3203 = vrot.lane.b32.xlu1 %v5597_v11, %s5947_s22 }
0x15c1   :  { %3201 = vrot.lane.b32.xlu1 %v5597_v11, %s5948_s29 }
0x162d   :  { %v2792_v3 = vpop.xlane.xlu1 %2791 }
0x162e   :  { %v2794_v61 = vsub.f32 %v2786_v59, %v2792_v3 }
0x162f   :  { %v2789_v4 = vpop.xlane.xlu0 %2788 }
0x1630   :  { %v2797_v5 = vmul.f32 1.442695, %v2794_v61  ;;  %v2793_v6 = vsub.f32 %v2785_v1, %v2789_v4 }
0x1631   :  { %v2886_v62 = vpop.permute.xlu1 %2885 }
0x1632   :  { %5100 = vpow2.f32 %v2797_v5  ;;  %v2795_v9 = vmul.f32 1.442695, %v2793_v6  ;;  %4915 = vmatpush3.msra.mxu1 %v2886_v62 }
0x1633   :  { %4924 = vmatprep.subr.mxu1 %v4515_v39 }
0x1634   :  { %5102 = vpow2.f32 %v2795_v9 }
0x1635   :  { %v3126_v18 = vpop.permute.xlu1 %3125 }
0x1639   :  { %v3204_v22 = vpop.permute.xlu1 %3203 }
0x163d   :  { %v3202_v24 = vpop.permute.xlu1 %3201 }
0x163f   :  { %v5101_v10 = vpop.eup %5100 }
0x1640   :  { %v2802_v37 = vsel %vm216_vm2, %v5101_v10, 0.0 }
0x1641   :  { %v5103_v13 = vpop.eup %5102  ;;  %2803 = vadd.xlane.f32.xlu0 %v2802_v37 }
0x1642   :  { %v2799_v14 = vsel %vm216_vm2, %v5103_v13, 0.0 }
0x1645   :  { %2800 = vadd.xlane.f32.xlu0 %v2799_v14 }
0x165b   :  { %2809 = vrot.lane.b32.xlu0 %v5599_v12, %s5150_s23 }
0x165f   :  { %3123 = vrot.lane.b32.xlu0 %v5599_v12, %s5948_s29 }
0x16ca   :  { %v2804_v15 = vpop.xlane.xlu0 %2803 }
0x16cb   :  { %5104 = vrcp.f32 %v2804_v15 }
0x16ce   :  { %v2801_v16 = vpop.xlane.xlu0 %2800 }
0x16cf   :  { %5106 = vrcp.f32 %v2801_v16 }
0x16d2   :  { %v2810_v17 = vpop.permute.xlu0 %2809 }
0x16d3   :  { %4910 = vmatpush3.msra.mxu0 %v2810_v17 }
0x16d4   :  { %4919 = vmatprep.subr.mxu0 %v4516_v25 }
0x16d6   :  { %v3124_v35 = vpop.permute.xlu0 %3123 }
0x16d8   :  { %v5105_v19 = vpop.eup %5104 }
0x16d9   :  { %v2808_v20 = vmul.f32 %v5105_v19, %v5101_v10  ;;  %v4517_v10 = vld [vmem:[%s5907_s6 + $0x30] sm:$0xff] }
0x16db   :  { %4917 = vmatmul.mubr.msk.f32.vlgmr.msra.gmra.mxu1 %vm216_vm2, %v2808_v20 }
0x16dc   :  { %v5107_v21 = vpop.eup %5106  ;;  %4926 = vmatprep.mubr.msk.f32.mxu1 %vm216_vm2, %v2547_v50  ;;  %4925 = vmatpush3.msra.mxu1 %v4515_v39 }
0x16dd   :  { %4934 = vmatprep.subr.mxu1 %v5144_v34  ;;  %v2807_v23 = vmul.f32 %v5107_v21, %v5103_v13 }
0x16df   :  { %4912 = vmatmul.mubr.msk.f32.vlgmr.msra.gmra.mxu0 %vm216_vm2, %v2807_v23  ;;  %4927 = vmatmul.mubr.msk.f32.vlgmr.msra.gmra.mxu1 %vm216_vm2, %v2623_v49 }
0x16e0   :  { %4935 = vmatpush3.xpose.msk.msra.mxu1 %vm216_vm2, %v3204_v22  ;;  %4936 = vmatprep.mubr.msk.f32.mxu1 %vm5145_vm1, %v5144_v34 }
0x16e1   :  { %4944 = vmatprep.subr.mxu1 %v5144_v34  ;;  %4920 = vmatpush3.msra.mxu0 %v4516_v25 }
0x16e2   :  { %4929 = vmatprep.subr.mxu0 %v5144_v34 }
0x16e3   :  { %4937 = vmatmul.mubr.msk.f32.vlgmr.msra.gmra.mxu1 %vm216_vm2, %v3202_v24 }
0x16e4   :  { %4946 = vmatprep.mubr.msk.f32.mxu1 %vm5145_vm1, %v5144_v34 }
0x179b   :  { %v2957_v26 = vpop.f32.mrf.mxu1 }
0x179d   :  { %v4918_v27 = vpop.f32.mrf.mxu1 }
0x179f   :  { %v2881_v28 = vpop.f32.mrf.mxu0  ;;  %v5700_v29 = vpop.f32.mrf.mxu1 }
0x17a0   :  { %4921 = vmatprep.mubr.msk.f32.mxu0 %vm216_vm2, %v2881_v28 }
0x17a1   :  { %v4913_v30 = vpop.f32.mrf.mxu0  ;;  %4922 = vmatmul.mubr.msk.f32.vlgmr.msra.gmra.mxu0 %vm216_vm2, %v2957_v26  ;;  %v5704_v48 = vpop.f32.mrf.mxu1 }
0x17a2   :  { %4930 = vmatpush3.xpose.msk.msra.mxu0 %vm216_vm2, %v3126_v18  ;;  %4931 = vmatprep.mubr.msk.f32.mxu0 %vm5145_vm1, %v5144_v34 }
0x17a3   :  { %v3275_v32 = vpop.f32.mrf.mxu1  ;;  %4939 = vmatprep.subr.mxu0 %v5144_v34 }
0x17a4   :  { %v3280_v43 = vmul.f32 0.35355338, %v3275_v32 }
0x17a5   :  { %4932 = vmatmul.mubr.msk.f32.vlgmr.msra.gmra.mxu0 %vm216_vm2, %v3124_v35  ;;  %v4938_v36 = vpop.f32.mrf.mxu1 }
0x17a6   :  { %v3282_v38 = vadd.f32 %v5656_v58, %v3280_v43  ;;  %4941 = vmatprep.mubr.msk.f32.mxu0 %vm5145_vm1, %v5144_v34 }
0x17a8   :  { %v3286_v40 = vsel %vm216_vm2, %v3282_v38, -inf }
0x17a9   :  { %3287 = vmax.xlane.f32.xlu1 %v3286_v40 }
0x17ba   :  { %3381 = vrot.lane.b32.xlu1 %v5597_v11, %s5949_s30 }
0x17be   :  { %3542 = vrot.lane.b32.xlu1 %v5599_v12, %s5950_s0 }
0x17c2   :  { %3620 = vrot.lane.b32.xlu1 %v5597_v11, %s5950_s0 }
0x17c6   :  { %3618 = vrot.lane.b32.xlu1 %v5597_v11, %s5951_s26 }
0x1832   :  { %v3288_v41 = vpop.xlane.xlu1 %3287 }
0x1833   :  { %v3290_v33 = vsub.f32 %v3282_v38, %v3288_v41 }
0x1835   :  { %v3293_v31 = vmul.f32 1.442695, %v3290_v33 }
0x1836   :  { %v3382_v42 = vpop.permute.xlu1 %3381 }
0x1837   :  { %4945 = vmatpush3.msra.mxu1 %v3382_v42  ;;  %5108 = vpow2.f32 %v3293_v31 }
0x1838   :  { %4954 = vmatprep.subr.mxu1 %v5144_v34 }
0x183a   :  { %v3543_v2 = vpop.permute.xlu1 %3542 }
0x183e   :  { %v3621_v16 = vpop.permute.xlu1 %3620 }
0x1842   :  { %v3619_v19 = vpop.permute.xlu1 %3618 }
0x1844   :  { %v5109_v52 = vpop.eup %5108 }
0x1845   :  { %v3298_v53 = vsel %vm216_vm2, %v5109_v52, 0.0 }
0x1861   :  { %v5724_v44 = vpop.f32.mrf.mxu0 }
0x1862   :  { %v3120_v24 = vadd.f32 %v5700_v29, %v5724_v44 }
0x1863   :  { %v5726_v45 = vpop.f32.mrf.mxu0 }
0x1864   :  { %v3115_v26 = vadd.f32 %v5704_v48, %v5726_v45 }
0x1865   :  { %v3197_v46 = vpop.f32.mrf.mxu0 }
0x1866   :  { %v3279_v47 = vmul.f32 0.35355338, %v3197_v46 }
0x1867   :  { %v4933_v49 = vpop.f32.mrf.mxu0 }
0x1868   :  { %v3281_v50 = vadd.f32 %v5663_v0, %v3279_v47  ;;  %v4518_v49 = vld [vmem:[%s5907_s6 + $0x38] sm:$0xff] }
0x186a   :  { %v3283_v51 = vsel %vm216_vm2, %v3281_v50, -inf }
0x186b   :  { %3284 = vmax.xlane.f32.xlu0 %v3283_v51 }
0x186f   :  { %3299 = vadd.xlane.f32.xlu0 %v3298_v53 }
0x18f4   :  { %v3285_v54 = vpop.xlane.xlu0 %3284 }
0x18f5   :  { %v3289_v55 = vsub.f32 %v3281_v50, %v3285_v54  ;;  %v4552_v54 = vld [vmem:[%s5908_s7 + $0x1] ss:$0 sm:$0xff] }
0x18f7   :  { %v3291_v56 = vmul.f32 1.442695, %v3289_v55 }
0x18f8   :  { %v3300_v57 = vpop.xlane.xlu0 %3299 }
0x18f9   :  { %5110 = vpow2.f32 %v3291_v56 }
0x18fa   :  { %5112 = vrcp.f32 %v3300_v57 }
0x1906   :  { %v5111_v59 = vpop.eup %5110 }
0x1907   :  { %v5113_v60 = vpop.eup %5112  ;;  %v3295_v63 = vsel %vm216_vm2, %v5111_v59, 0.0 }
0x1908   :  { %3296 = vadd.xlane.f32.xlu0 %v3295_v63  ;;  %v3304_v1 = vmul.f32 %v5113_v60, %v5109_v52 }
0x190a   :  { %4947 = vmatmul.mubr.msk.f32.vlgmr.msra.gmra.mxu1 %vm216_vm2, %v3304_v1 }
0x190b   :  { %4955 = vmatpush3.xpose.msk.msra.mxu1 %vm216_vm2, %v3543_v2  ;;  %4956 = vmatprep.mubr.msk.f32.mxu1 %vm5145_vm1, %v5144_v34 }
0x190c   :  { %4964 = vmatprep.subr.mxu1 %v5144_v34 }
0x191e   :  { %3305 = vrot.lane.b32.xlu0 %v5599_v12, %s5949_s30 }
0x1922   :  { %3540 = vrot.lane.b32.xlu0 %v5599_v12, %s5951_s26 }
0x1991   :  { %v3297_v3 = vpop.xlane.xlu0 %3296 }
0x1992   :  { %5114 = vrcp.f32 %v3297_v3 }
0x1995   :  { %v3306_v61 = vpop.permute.xlu0 %3305 }
0x1996   :  { %4940 = vmatpush3.msra.mxu0 %v3306_v61 }
0x1997   :  { %4949 = vmatprep.subr.mxu0 %v4517_v10 }
0x1999   :  { %v3541_v4 = vpop.permute.xlu0 %3540 }
0x199a   :  { %4957 = vmatmul.mubr.msk.f32.vlgmr.msra.gmra.mxu1 %vm216_vm2, %v3541_v4 }
0x199b   :  { %4966 = vmatprep.mubr.msk.f32.mxu1 %vm5145_vm1, %v5144_v34 }
0x199f   :  { %v5115_v5 = vpop.eup %5114 }
0x19a0   :  { %v3303_v6 = vmul.f32 %v5115_v5, %v5111_v59 }
0x19a2   :  { %4942 = vmatmul.mubr.msk.f32.vlgmr.msra.gmra.mxu0 %vm216_vm2, %v3303_v6 }
0x19a3   :  { %4950 = vmatpush3.msra.mxu0 %v4517_v10 }
0x19a4   :  { %4959 = vmatprep.subr.mxu0 %v5144_v34 }
0x19ca   :  { %v3453_v62 = vpop.f32.mrf.mxu1 }
0x19cc   :  { %v4948_v9 = vpop.f32.mrf.mxu1 }
0x1a5a   :  { %v3614_v37 = vpop.f32.mrf.mxu1 }
0x1a5b   :  { %v3696_v13 = vmul.f32 0.35355338, %v3614_v37 }
0x1a5c   :  { %v4958_v14 = vpop.f32.mrf.mxu1 }
0x1a5d   :  { %v3698_v39 = vadd.f32 %v5663_v0, %v3696_v13  ;;  %v4559_v14 = vld [vmem:[%s5909_s10 + $0x30] sm:$0xff] }
0x1a5f   :  { %v3700_v15 = vsel %vm216_vm2, %v3698_v39, -inf }
0x1a60   :  { %3701 = vmax.xlane.f32.xlu0 %v3700_v15  ;;  %v4557_v15 = vld [vmem:[%s5909_s10 + $0x20] sm:$0xff] }
0x1a62   :  { %v3377_v17 = vpop.f32.mrf.mxu0 }
0x1a63   :  { %4951 = vmatprep.mubr.msk.f32.mxu0 %vm216_vm2, %v3377_v17 }
0x1a64   :  { %v4943_v18 = vpop.f32.mrf.mxu0  ;;  %4952 = vmatmul.mubr.msk.f32.vlgmr.msra.gmra.mxu0 %vm216_vm2, %v3453_v62 }
0x1a65   :  { %4960 = vmatpush3.xpose.msk.msra.mxu0 %vm216_vm2, %v3621_v16  ;;  %4961 = vmatprep.mubr.msk.f32.mxu0 %vm5145_vm1, %v5144_v34 }
0x1a66   :  { %4969 = vmatprep.subr.mxu0 %v5144_v34 }
0x1a68   :  { %4962 = vmatmul.mubr.msk.f32.vlgmr.msra.gmra.mxu0 %vm216_vm2, %v3619_v19 }
0x1a69   :  { %4971 = vmatprep.mubr.msk.f32.mxu0 %vm5145_vm1, %v5144_v34 }
0x1ae9   :  { %v3702_v0 = vpop.xlane.xlu0 %3701 }
0x1aea   :  { %v3706_v20 = vsub.f32 %v3698_v39, %v3702_v0  ;;  %v4558_v39 = vld [vmem:[%s5909_s10 + $0x28] sm:$0xff] }
0x1aec   :  { %v3708_v21 = vmul.f32 1.442695, %v3706_v20 }
0x1aee   :  { %5116 = vpow2.f32 %v3708_v21 }
0x1afb   :  { %v5117_v22 = vpop.eup %5116 }
0x1afc   :  { %v3712_v23 = vsel %vm216_vm2, %v5117_v22, 0.0 }
0x1afd   :  { %3713 = vadd.xlane.f32.xlu0 %v3712_v23 }
0x1b24   :  { %v4953_v25 = vpop.f32.mrf.mxu0 }
0x1b25   :  { %v3539_v27 = vadd.f32 %v4953_v25, %v3120_v24 }
0x1b26   :  { %v3529_v28 = vpop.f32.mrf.mxu0 }
0x1b27   :  { %v3538_v30 = vadd.f32 %v3529_v28, %v3115_v26 }
0x1b28   :  { %v3692_v32 = vpop.f32.mrf.mxu0 }
0x1b29   :  { %v3697_v35 = vmul.f32 0.35355338, %v3692_v32 }
0x1b2a   :  { %v4963_v43 = vpop.f32.mrf.mxu0 }
0x1b2b   :  { %v3699_v36 = vadd.f32 %v5656_v58, %v3697_v35  ;;  %v4572_v35 = vld [vmem:[%s5912_s12 + $0x78] sm:$0xff]  ;;  %v4571_v43 = vld [vmem:[%s5912_s12 + $0x70] sm:$0xff] }
0x1b2d   :  { %v3703_v38 = vsel %vm216_vm2, %v3699_v36, -inf }
0x1b2e   :  { %3704 = vmax.xlane.f32.xlu1 %v3703_v38  ;;  %v4569_v38 = vld [vmem:[%s5912_s12 + $0x60] sm:$0xff] }
0x1b3f   :  { %3798 = vrot.lane.b32.xlu1 %v5597_v11, %s5952_s25 }
0x1b86   :  { %v3714_v58 = vpop.xlane.xlu0 %3713 }
0x1bb7   :  { %v3705_v40 = vpop.xlane.xlu1 %3704 }
0x1bb8   :  { %v3707_v29 = vsub.f32 %v3699_v36, %v3705_v40  ;;  %v4570_v36 = vld [vmem:[%s5912_s12 + $0x68] sm:$0xff]  ;;  %v4568_v40 = vld [vmem:[%s5912_s12 + $0x58] sm:$0xff] }
0x1bba   :  { %v3710_v41 = vmul.f32 1.442695, %v3707_v29  ;;  %v4567_v29 = vld [vmem:[%s5912_s12 + $0x50] sm:$0xff] }
0x1bbb   :  { %v3799_v42 = vpop.permute.xlu1 %3798 }
0x1bbc   :  { %5118 = vpow2.f32 %v3710_v41  ;;  %4970 = vmatpush3.msra.mxu0 %v3799_v42  ;;  %v4566_v41 = vld [vmem:[%s5912_s12 + $0x48] sm:$0xff]  ;;  %v4565_v42 = vld [vmem:[%s5912_s12 + $0x40] sm:$0xff] }
0x1bbd   :  { %5120 = vrcp.f32 %v3714_v58 }
0x1bc9   :  { %v5119_v48 = vpop.eup %5118 }
0x1bca   :  { %v3715_v33 = vsel %vm216_vm2, %v5119_v48, 0.0  ;;  %v5121_v44 = vpop.eup %5120 }
0x1bcb   :  { %3716 = vadd.xlane.f32.xlu0 %v3715_v33  ;;  %v3720_v11 = vmul.f32 %v5121_v44, %v5117_v22  ;;  %v4555_v22 = vld [vmem:[%s5910_s8 + $0x1] ss:$0 sm:$0xff] }
0x1be1   :  { %3722 = vrot.lane.b32.xlu0 %v5599_v12, %s5952_s25 }
0x1c54   :  { %v3717_v31 = vpop.xlane.xlu0 %3716 }
0x1c55   :  { %5122 = vrcp.f32 %v3717_v31 }
0x1c58   :  { %v3723_v45 = vpop.permute.xlu0 %3722 }
0x1c59   :  { %4965 = vmatpush3.msra.mxu1 %v3723_v45 }
0x1c5a   :  { %4967 = vmatmul.mubr.msk.f32.vlgmr.msra.gmra.mxu1 %vm216_vm2, %v3720_v11  ;;  %4974 = vmatprep.subr.mxu1 %v4518_v49 }
0x1c5b   :  { %4975 = vmatpush3.msra.mxu1 %v4518_v49 }
0x1c5c   :  { %4990 = vmatprep.subr.mxu1 %v4572_v35 }
0x1c62   :  { %v5123_v46 = vpop.eup %5122 }
0x1c63   :  { %v3721_v47 = vmul.f32 %v5123_v46, %v5119_v48  ;;  %v4562_v48 = vld [vmem:[%s5913_s11 + $0x1] ss:$0 sm:$0xff] }
0x1c65   :  { %4972 = vmatmul.mubr.msk.f32.vlgmr.msra.gmra.mxu0 %vm216_vm2, %v3721_v47 }
0x1d1a   :  { %v3794_v12 = vpop.f32.mrf.mxu1 }
0x1d1b   :  { %4976 = vmatprep.mubr.msk.f32.mxu1 %vm216_vm2, %v3794_v12 }
0x1d1c   :  { %v4968_v50 = vpop.f32.mrf.mxu1 }
0x1d25   :  { %v3870_v51 = vpop.f32.mrf.mxu0 }
0x1d26   :  { %4977 = vmatmul.mubr.msk.f32.vlgmr.msra.gmra.mxu1 %vm216_vm2, %v3870_v51 }
0x1d27   :  { %v4973_v52 = vpop.f32.mrf.mxu0  ;;  %4991 = vmatpush3.msra.mxu1 %v4572_v35 }
0x1d28   :  { %4992 = vmatprep.subr.mxu1 %v4571_v43 }
0x1d29   :  { %4993 = vmatpush3.msra.mxu1 %v4571_v43  ;;  %v4580_v43 = vld [vmem:[%s5916_s15 + $0x1] ss:$0 sm:$0xff] }
0x1d2a   :  { %4994 = vmatprep.subr.mxu1 %v4570_v36 }
0x1d2b   :  { %4995 = vmatpush3.msra.mxu1 %v4570_v36 }
0x1d2c   :  { %4996 = vmatprep.subr.mxu1 %v4569_v38 }
0x1d2d   :  { %4997 = vmatpush3.msra.mxu1 %v4569_v38 }
0x1d2e   :  { %4998 = vmatprep.subr.mxu1 %v4568_v40 }
0x1d2f   :  { %4999 = vmatpush3.msra.mxu1 %v4568_v40 }
0x1d30   :  { %5000 = vmatprep.subr.mxu1 %v4567_v29 }
0x1d31   :  { %5001 = vmatpush3.msra.mxu1 %v4567_v29 }
0x1d32   :  { %5002 = vmatprep.subr.mxu1 %v4566_v41 }
0x1d33   :  { %5003 = vmatpush3.msra.mxu1 %v4566_v41 }
0x1d34   :  { %5004 = vmatprep.subr.mxu1 %v4565_v42 }
0x1d35   :  { %5005 = vmatpush3.msra.mxu1 %v4565_v42 }
0x1de6   :  { %v4978_v53 = vpop.f32.mrf.mxu1 }
0x1de7   :  { %v3956_v55 = vadd.f32 %v4978_v53, %v3539_v27  ;;  %v4556_v27 = vld [vmem:[%s5911_s9 + $0x1] ss:$0 sm:$0xff] }
0x1de8   :  { %v3946_v56 = vpop.f32.mrf.mxu1 }
0x1de9   :  { %v3966_v57 = vadd.f32 %v4552_v54, %v3956_v55  ;;  %v3955_v59 = vadd.f32 %v3946_v56, %v3538_v30 }
0x1deb   :  { %v3965_v60 = vadd.f32 %v4552_v54, %v3955_v59  ;;  %v3968_v63 = vadd.f32 %v3966_v57, %v5586_v8 }
0x1ded   :  { %v3976_v1 = vsel %vm71_vm0, %v3968_v63, 0.0  ;;  %v3967_v2 = vadd.f32 %v3965_v60, %v5584_v7  ;;  %v4560_v7 = vld [vmem:[%s5909_s10 + $0x38] sm:$0xff] }
0x1dee   :  { %3977 = vadd.xlane.f32.xlu0 %v3976_v1  ;;  %4979 = vmatprep.subr.mxu0 %v4560_v7 }
0x1def   :  { %v3973_v3 = vsel %vm71_vm0, %v3967_v2, 0.0  ;;  %4980 = vmatpush3.msra.mxu0 %v4560_v7 }
0x1df0   :  { %3974 = vadd.xlane.f32.xlu1 %v3973_v3  ;;  %4981 = vmatprep.subr.mxu0 %v4559_v14 }
0x1df1   :  { %4982 = vmatpush3.msra.mxu0 %v4559_v14 }
0x1df2   :  { %4983 = vmatprep.subr.mxu0 %v4558_v39 }
0x1df3   :  { %4984 = vmatpush3.msra.mxu0 %v4558_v39 }
0x1df4   :  { %4985 = vmatprep.subr.mxu0 %v4557_v15 }
0x1df5   :  { %4986 = vmatpush3.msra.mxu0 %v4557_v15 }
0x1df6   :  { %5009 = vmatprep.subr.mxu0 %v5144_v34 }
0x1e77   :  { %v3978_v61 = vpop.xlane.xlu0 %3977 }
0x1e78   :  { %v3980_v4 = vmul.f32 0.03125, %v3978_v61 }
0x1e79   :  { %v3975_v5 = vpop.xlane.xlu1 %3974 }
0x1e7a   :  { %v3982_v6 = vsub.f32 %v3968_v63, %v3980_v4  ;;  %v3979_v62 = vmul.f32 0.03125, %v3975_v5 }
0x1e7c   :  { %v3981_v9 = vsub.f32 %v3967_v2, %v3979_v62  ;;  %v3984_v10 = vmul.f32 %v3982_v6, %v3982_v6  ;;  %v4574_v2 = vld [vmem:[%s5914_s13 + $0x1] ss:$0 sm:$0xff] }
0x1e7e   :  { %v3988_v37 = vsel %vm71_vm0, %v3984_v10, 0.0  ;;  %v3983_v13 = vmul.f32 %v3981_v9, %v3981_v9 }
0x1e7f   :  { %3989 = vadd.xlane.f32.xlu1 %v3988_v37 }
0x1e80   :  { %v3985_v8 = vsel %vm71_vm0, %v3983_v13, 0.0 }
0x1e81   :  { %3986 = vadd.xlane.f32.xlu0 %v3985_v8 }
0x1f08   :  { %v3990_v16 = vpop.xlane.xlu1 %3989 }
0x1f09   :  { %v3992_v17 = vmul.f32 0.03125, %v3990_v16 }
0x1f0a   :  { %v3987_v18 = vpop.xlane.xlu0 %3986 }
0x1f0b   :  { %v3994_v19 = vadd.f32 1e-12, %v3992_v17  ;;  %v3991_v0 = vmul.f32 0.03125, %v3987_v18 }
0x1f0d   :  { %5124 = vrsqrt.f32 %v3994_v19  ;;  %v3993_v20 = vadd.f32 1e-12, %v3991_v0  ;;  %v4276_v19 = vld [vmem:[%s5917_s16 + $0x18] sm:$0xff]  ;;  %v4275_v0 = vld [vmem:[%s5917_s16 + $0x10] sm:$0xff] }
0x1f0f   :  { %5126 = vrsqrt.f32 %v3993_v20  ;;  %v4274_v20 = vld [vmem:[%s5917_s16 + $0x8] sm:$0xff] }
0x1f1a   :  { %v5125_v21 = vpop.eup %5124 }
0x1f1b   :  { %v3998_v23 = vmul.f32 %v5125_v21, %v3982_v6  ;;  %v4273_v21 = vld [vmem:[%s5917_s16] sm:$0xff] }
0x1f1c   :  { %v5127_v24 = vpop.eup %5126 }
0x1f1d   :  { %v3997_v25 = vmul.f32 %v5127_v24, %v3981_v9  ;;  %v4006_v26 = vmul.f32 %v4555_v22, %v3998_v23 }
0x1f1f   :  { %v4005_v28 = vmul.f32 %v4555_v22, %v3997_v25  ;;  %v4014_v32 = vadd.f32 %v4556_v27, %v4006_v26 }
0x1f21   :  { %v5807_v30 = vadd.f32 %v4556_v27, %v4005_v28 }
0x1f23   :  { %4987 = vmatprep.mubr.msk.f32.mxu0 %vm71_vm0, %v5807_v30 }
0x1f24   :  { %4988 = vmatmul.mubr.msk.f32.vlgmr.msra.gmra.mxu0 %vm71_vm0, %v4014_v32 }
0x1f25   :  { %5017 = vmatprep.mubr.msk.f32.mxu0 %vm5145_vm1, %v5144_v34  ;;  %5010 = vmatpush3.msra.mxu0 %v4276_v19 }
0x1f26   :  { %5011 = vmatprep.subr.mxu0 %v5144_v34 }
0x1f27   :  { %5012 = vmatpush3.msra.mxu0 %v4275_v0 }
0x1f28   :  { %5013 = vmatprep.subr.mxu0 %v5144_v34 }
0x1f29   :  { %5014 = vmatpush3.msra.mxu0 %v4274_v20 }
0x1f2a   :  { %5015 = vmatprep.subr.mxu0 %v5144_v34 }
0x1f2b   :  { %5016 = vmatpush3.msra.mxu0 %v4273_v21 }
0x1f2c   :  { %5020 = vmatprep.subr.mxu0 %v5144_v34 }
0x1fe4   :  { %v4989_v33 = vpop.f32.mrf.mxu0 }
0x1fe5   :  { %v4106_v58 = vadd.f32 %v4989_v33, %v4562_v48  ;;  %v4365_v33 = vld [vmem:[%s5918_s18 + $0x18] sm:$0xff] }
0x1fe6   :  { %v4100_v31 = vpop.f32.mrf.mxu0 }
0x1fe7   :  { %v4112_v44 = vmul.f32 0.044715, %v4106_v58  ;;  %v4101_v45 = vadd.f32 %v4562_v48, %v4100_v31  ;;  %v4110_v60 = vmul.f32 0.5, %v4106_v58  ;;  %v4363_v31 = vld [vmem:[%s5918_s18 + $0x8] sm:$0xff] }
0x1fe9   :  { %v4114_v11 = vmul.f32 %v4112_v44, %v4106_v58  ;;  %v4111_v46 = vmul.f32 0.044715, %v4101_v45  ;;  %v4109_v57 = vmul.f32 0.5, %v4101_v45  ;;  %v4362_v44 = vld [vmem:[%s5918_s18] sm:$0xff] }
0x1feb   :  { %v4116_v47 = vmul.f32 %v4114_v11, %v4106_v58  ;;  %v4113_v49 = vmul.f32 %v4111_v46, %v4101_v45  ;;  %v4581_v11 = vld [vmem:[%s5920_s17] ss:$0 sm:$0xff] }
0x1fed   :  { %v4118_v12 = vadd.f32 %v4116_v47, %v4106_v58  ;;  %v4115_v50 = vmul.f32 %v4113_v49, %v4101_v45  ;;  %v4364_v58 = vld [vmem:[%s5918_s18 + $0x10] sm:$0xff] }
0x1fef   :  { %v4120_v51 = vmul.f32 0.7978846, %v4118_v12  ;;  %v4117_v52 = vadd.f32 %v4115_v50, %v4101_v45  ;;  %v25_v45 = vstv %s5919_s19 }
0x1ff0   :  { %26 = vst [vmem:[#allocation2] sm:$0x1] %v25_v45 }
0x1ff1   :  { %5128 = vtanh.f32 %v4120_v51  ;;  %v4119_v53 = vmul.f32 0.7978846, %v4117_v52 }
0x1ff3   :  { %5130 = vtanh.f32 %v4119_v53 }
0x1ff7   :  { %v4583_v50 = vld [vmem:[#allocation2] ss:$0 sm:$0xff] }
0x1ffe   :  { %v5129_v54 = vpop.eup %5128 }
0x1fff   :  { %v4124_v56 = vadd.f32 1.0, %v5129_v54 }
0x2000   :  { %v5131_v55 = vpop.eup %5130 }
0x2001   :  { %v4123_v59 = vadd.f32 1.0, %v5131_v55  ;;  %v4126_v1 = vmul.f32 %v4124_v56, %v4110_v60 }
0x2003   :  { %v4125_v63 = vmul.f32 %v4123_v59, %v4109_v57 }
0x2005   :  { %5006 = vmatprep.mubr.msk.f32.mxu1 %vm2068_vm3, %v4125_v63 }
0x2006   :  { %5007 = vmatmul.mubr.msk.f32.vlgmr.msra.gmra.mxu1 %vm2068_vm3, %v4126_v1 }
0x20c6   :  { %v5008_v3 = vpop.f32.mrf.mxu1 }
0x20c7   :  { %v4222_v61 = vadd.f32 %v5008_v3, %v4574_v2 }
0x20c8   :  { %v4216_v4 = vpop.f32.mrf.mxu1 }
0x20c9   :  { %v4217_v5 = vadd.f32 %v4574_v2, %v4216_v4  ;;  %v4226_v6 = vadd.f32 %v4222_v61, %v4014_v32 }
0x20cb   :  { %v4234_v62 = vsel %vm71_vm0, %v4226_v6, 0.0  ;;  %v4225_v9 = vadd.f32 %v4217_v5, %v5807_v30  ;;  %v4579_v30 = vld [vmem:[%s5915_s14 + $0x1] ss:$0 sm:$0xff] }
0x20cc   :  { %4235 = vadd.xlane.f32.xlu0 %v4234_v62 }
0x20cd   :  { %v4231_v10 = vsel %vm71_vm0, %v4225_v9, 0.0 }
0x20ce   :  { %4232 = vadd.xlane.f32.xlu1 %v4231_v10 }
0x2155   :  { %v4236_v37 = vpop.xlane.xlu0 %4235 }
0x2156   :  { %v4238_v13 = vmul.f32 0.03125, %v4236_v37 }
0x2157   :  { %v4233_v8 = vpop.xlane.xlu1 %4232 }
0x2158   :  { %v4240_v7 = vsub.f32 %v4226_v6, %v4238_v13  ;;  %v4237_v14 = vmul.f32 0.03125, %v4233_v8 }
0x215a   :  { %v4239_v39 = vsub.f32 %v4225_v9, %v4237_v14  ;;  %v4242_v15 = vmul.f32 %v4240_v7, %v4240_v7 }
0x215c   :  { %v4246_v16 = vsel %vm71_vm0, %v4242_v15, 0.0  ;;  %v4241_v17 = vmul.f32 %v4239_v39, %v4239_v39 }
0x215d   :  { %4247 = vadd.xlane.f32.xlu0 %v4246_v16 }
0x215e   :  { %v4243_v18 = vsel %vm71_vm0, %v4241_v17, 0.0 }
0x215f   :  { %4244 = vadd.xlane.f32.xlu1 %v4243_v18 }
0x21e6   :  { %v4248_v22 = vpop.xlane.xlu0 %4247 }
0x21e7   :  { %v4250_v23 = vmul.f32 0.03125, %v4248_v22 }
0x21e8   :  { %v4245_v24 = vpop.xlane.xlu1 %4244 }
0x21e9   :  { %v4252_v25 = vadd.f32 1e-12, %v4250_v23  ;;  %v4249_v26 = vmul.f32 0.03125, %v4245_v24 }
0x21eb   :  { %5132 = vrsqrt.f32 %v4252_v25  ;;  %v4251_v27 = vadd.f32 1e-12, %v4249_v26 }
0x21ed   :  { %5134 = vrsqrt.f32 %v4251_v27 }
0x21f8   :  { %v5133_v28 = vpop.eup %5132 }
0x21f9   :  { %v4256_v32 = vmul.f32 %v5133_v28, %v4240_v7 }
0x21fa   :  { %v5135_v35 = vpop.eup %5134 }
0x21fb   :  { %v4255_v36 = vmul.f32 %v5135_v35, %v4239_v39  ;;  %v4264_v38 = vmul.f32 %v4579_v30, %v4256_v32 }
0x21fd   :  { %v4263_v40 = vmul.f32 %v4579_v30, %v4255_v36  ;;  %v4272_v29 = vadd.f32 %v4580_v43, %v4264_v38 }
0x21ff   :  { %v4271_v41 = vadd.f32 %v4580_v43, %v4263_v40  ;;  %v4286_v42 = vrot.slane %v4272_v29, 7 }
0x2201   :  { %v4288_v48 = vsel %vm4287_vm4, %v4286_v42, %v4271_v41 }
0x2202   :  { %5018 = vmatmul.mubr.msk.f32.vlgmr.msra.gmra.mxu0 %vm71_vm0, %v4288_v48 }
0x2203   :  { %5028 = vmatprep.mubr.msk.f32.mxu0 %vm5145_vm1, %v5144_v34  ;;  %5021 = vmatpush3.msra.mxu0 %v4365_v33 }
0x2204   :  { %5022 = vmatprep.subr.mxu0 %v5144_v34 }
0x2205   :  { %5023 = vmatpush3.msra.mxu0 %v4364_v58 }
0x2206   :  { %5024 = vmatprep.subr.mxu0 %v5144_v34 }
0x2207   :  { %5025 = vmatpush3.msra.mxu0 %v4363_v31 }
0x2208   :  { %5026 = vmatprep.subr.mxu0 %v5144_v34 }
0x2209   :  { %5027 = vmatpush3.msra.mxu0 %v4362_v44 }
0x22c2   :  { %v4357_v46 = vpop.f32.mrf.mxu0 }
0x22c3   :  { %v4358_v47 = vadd.f32 %v4581_v11, %v4357_v46 }
0x22c4   :  { %v5019_v49 = vpop.f32.mrf.mxu0 }
0x22c5   :  { %5136 = vtanh.f32 %v4358_v47 }
0x22d2   :  { %v5137_v12 = vpop.eup %5136 }
0x22d3   :  { %5029 = vmatmul.mubr.msk.f32.vlgmr.msra.gmra.mxu0 %vm71_vm0, %v5137_v12 }
0x2393   :  { %v4442_v51 = vpop.f32.mrf.mxu0 }
0x2394   :  { %v4443_v34 = vadd.f32 %v4583_v50, %v4442_v51 }
0x2395   :  { %v5030_v52 = vpop.f32.mrf.mxu0 }
0x2396   :  { %v4446_v53 = vsub.f32 0.0, %v4443_v34 }
0x2398   :  { %v4447_v54 = vmul.f32 1.442695, %v4446_v53 }
0x239a   :  { %5138 = vpow2.f32 %v4447_v54 }
0x23a7   :  { %v5139_v55 = vpop.eup %5138 }
0x23a8   :  { %v4449_v56 = vadd.f32 1.0, %v5139_v55 }
0x23aa   :  { %5140 = vrcp.f32 %v4449_v56 }
0x23b7   :  { %v5141_v57 = vpop.eup %5140 }
0x23b8   :  { %4452 = vst.msk [vmem:[%s5921_s20] sm:$0x3] %vm4451_vm5, %v5141_v57 }

</bundles_post_ra>
